<compile_context>
chip_gen: v5e
topology: v5e:2x2
jax: 0.10.0
libtpu: 0.0.40
codegen_flags: <defaults>
</compile_context>

<pallas_src>
import functools

import jax
import jax.numpy as jnp
from jax.experimental import pallas as pl
from jax.experimental.pallas import tpu as pltpu


def _round_up(x, m):
    return ((x + m - 1) // m) * m


# ----------------------------- Pallas kernels -------------------------------

def _head_kernel_fused(xm_ref, xh_ref, w1_ref, scale_ref, shift_ref, w2_ref, b2_ref,
                       o_ref, xflat_ref, col_ref, *, wp, cin, tile_h):
    """3x3 conv as ONE K=9*Cin MXU dot -> folded BN -> ReLU -> 1x1 conv + bias.

    Flat 'junk-column' spatial grid of width wp = W+2: output flat index
    m = r*wp + q; columns q in {W, W+1} are junk and are dropped (for free) in the
    wrapper's output transpose pass.

    xm_ref:    (1, tile_h*wp, Cin)        bf16 main row tile (flat)
    xh_ref:    (1, hr*wp, Cin)            bf16 bottom halo rows (flat)
    w1_ref:    (9*Cin, Cinter)            bf16 tap-major 3x3 weights
    o_ref:     (1, tile_h*wp, Cout)       unpadded-channel output tile
    xflat_ref: ((tile_h+hr)*wp, Cin)      bf16 slab scratch
    col_ref:   (tile_h*wp, 9*Cin)         bf16 im2col scratch
    """
    m = tile_h * wp
    # One contiguous, sublane-aligned seam assembly (main tile + small halo).
    xflat_ref[0:m] = xm_ref[0]
    xflat_ref[m:] = xh_ref[0]
    # im2col: each tap is a contiguous row-shifted slice of the flat slab.
    for k in range(9):
        ky, kx = divmod(k, 3)
        s = ky * wp + kx
        col_ref[:, k * cin:(k + 1) * cin] = xflat_ref[s:s + m, :]
    # Single fused MXU contraction, f32 accumulation.
    acc = jnp.dot(col_ref[...], w1_ref[...], preferred_element_type=jnp.float32)
    # Folded BatchNorm (eval) + ReLU kept in f32 (v5e-safe elementwise path).
    h = jnp.maximum(acc * scale_ref[...] + shift_ref[...], 0.0)
    # 1x1 conv + bias; channel dim of the store is unpadded (minimal HBM bytes).
    o = jnp.dot(h.astype(w2_ref.dtype), w2_ref[...],
                preferred_element_type=jnp.float32) + b2_ref[...]
    o_ref[0] = o.astype(o_ref.dtype)


def _head_kernel_taps(xm_ref, xh_ref, w1_ref, scale_ref, shift_ref, w2_ref, b2_ref,
                      o_ref, xflat_ref, *, wp, tile_h):
    """Same computation for large Cin: 9 dots with K=Cin read the slab slices
    directly (no im2col copies); K>=128 already fills the MXU."""
    m = tile_h * wp
    xflat_ref[0:m] = xm_ref[0]
    xflat_ref[m:] = xh_ref[0]
    acc = None
    for k in range(9):
        ky, kx = divmod(k, 3)
        s = ky * wp + kx
        d = jnp.dot(xflat_ref[s:s + m, :], w1_ref[k],
                    preferred_element_type=jnp.float32)
        acc = d if acc is None else acc + d
    h = jnp.maximum(acc * scale_ref[...] + shift_ref[...], 0.0)
    o = jnp.dot(h.astype(w2_ref.dtype), w2_ref[...],
                preferred_element_type=jnp.float32) + b2_ref[...]
    o_ref[0] = o.astype(o_ref.dtype)


def _conv1x1_kernel(x_ref, w_ref, b_ref, o_ref):
    """num_convs=0 path, NCHW streaming: (Cout,Cin) @ (Cin,tile_s) + bias."""
    o = jnp.dot(w_ref[...], x_ref[0].astype(w_ref.dtype),
                preferred_element_type=jnp.float32)
    o_ref[0] = (o + b_ref[...]).astype(o_ref.dtype)


# ------------------------------- wrappers ------------------------------------

def head_forward_convs1(x_nchw, w3x3, gamma, beta, mean, var, w1x1, b1x1,
                        *, eps=1e-5, tile_h=None, compute_dtype=jnp.bfloat16):
    """Head with num_convs=1: 3x3 conv(pad=1, no bias) -> BN(eval) -> ReLU -> 1x1 conv.

    Note: matmul operands are bf16 with f32 accumulation (matches a bf16 reference
    tightly; ~5e-2 vs a pure-f32 reference)."""
    N, Cin, H, W = x_nchw.shape
    Cinter = w3x3.shape[0]
    Cout = w1x1.shape[0]
    wp = W + 2                           # padded row width (1px conv halo each side)
    hr = 4 if wp % 2 == 0 else 8         # halo rows: >=3 needed, 8-sublane aligned

    if tile_h is None:
        # ~2048 flattened rows per step amortizes the ~0.35us/step pipeline cost,
        # but keep >=2 row tiles when H allows (megacore split on v7x), and keep the
        # bf16 input tile (+9x im2col when fused) well inside the VMEM budget.
        th = max(8, (2048 // wp) // 8 * 8)
        th = min(th, _round_up(H, 8))
        if H > 8:
            th = min(th, _round_up((H + 1) // 2, 8))
        cap_in = max(8, (2 * 1024 * 1024 // (wp * Cin * 2)) // 8 * 8)
        th = min(th, cap_in)
        if Cin <= 64:
            cap_col = max(8, (6 * 1024 * 1024 // (wp * 9 * Cin * 2)) // 8 * 8)
            th = min(th, cap_col)
        tile_h = max(8, th)
    else:
        tile_h = max(8, _round_up(tile_h, 8))
    assert tile_h % 8 == 0 and tile_h % hr == 0
    halo_step = tile_h // hr
    num_t = -(-H // tile_h)
    hp = num_t * tile_h
    rows = hp + hr                       # total padded rows delivered to the kernel
    m = tile_h * wp                      # flattened (junk-grid) rows per tile

    # Single fused input pass: NCHW -> NHWC, cast to MXU dtype, spatial pad, and a
    # free flattening reshape (rows merged into one sublane-friendly flat axis).
    x = jnp.transpose(x_nchw, (0, 2, 3, 1)).astype(compute_dtype)
    xp = jnp.pad(x, ((0, 0), (1, rows - 1 - H), (1, 1), (0, 0)))
    xp = xp.reshape(N, rows * wp, Cin)

    # Fold eval-mode BatchNorm into per-channel scale/shift (f32 epilogue).
    scale = (gamma / jnp.sqrt(var + eps)).astype(jnp.float32)
    shift = (beta.astype(jnp.float32) - mean.astype(jnp.float32) * scale)
    scale = scale.reshape(1, Cinter)
    shift = shift.reshape(1, Cinter)

    # PyTorch OIHW -> tap-major (9, Cin, Cinter) and (Cinter, Cout), cast once.
    w1 = jnp.transpose(w3x3, (2, 3, 1, 0)).reshape(9, Cin, Cinter).astype(compute_dtype)
    w2 = jnp.transpose(w1x1, (2, 3, 1, 0)).reshape(Cinter, Cout).astype(compute_dtype)
    b2 = b1x1.astype(jnp.float32).reshape(1, Cout)

    fuse_taps = Cin <= 64
    if fuse_taps:
        w1 = w1.reshape(9 * Cin, Cinter)
        kernel = functools.partial(_head_kernel_fused, wp=wp, cin=Cin, tile_h=tile_h)
        w1_spec = pl.BlockSpec((9 * Cin, Cinter), lambda n, i: (0, 0))
        scratch = [pltpu.VMEM(((tile_h + hr) * wp, Cin), compute_dtype),
                   pltpu.VMEM((m, 9 * Cin), compute_dtype)]
    else:
        kernel = functools.partial(_head_kernel_taps, wp=wp, tile_h=tile_h)
        w1_spec = pl.BlockSpec((9, Cin, Cinter), lambda n, i: (0, 0, 0))
        scratch = [pltpu.VMEM(((tile_h + hr) * wp, Cin), compute_dtype)]

    out = pl.pallas_call(
        kernel,
        out_shape=jax.ShapeDtypeStruct((N, hp * wp, Cout), x_nchw.dtype),
        grid_spec=pltpu.PrefetchScalarGridSpec(
            num_scalar_prefetch=0,
            grid=(N, num_t),
            in_specs=[
                # main flat row tile: padded rows [i*tile_h, (i+1)*tile_h)
                pl.BlockSpec((1, m, Cin), lambda n, i: (n, i, 0)),
                # bottom halo: padded rows [(i+1)*tile_h, (i+1)*tile_h + hr)
                pl.BlockSpec((1, hr * wp, Cin),
                             lambda n, i: (n, (i + 1) * halo_step, 0)),
                # weights / BN params: constant index_map -> fetched once, resident
                w1_spec,
                pl.BlockSpec((1, Cinter), lambda n, i: (0, 0)),
                pl.BlockSpec((1, Cinter), lambda n, i: (0, 0)),
                pl.BlockSpec((Cinter, Cout), lambda n, i: (0, 0)),
                pl.BlockSpec((1, Cout), lambda n, i: (0, 0)),
            ],
            out_specs=pl.BlockSpec((1, m, Cout), lambda n, i: (n, i, 0)),
            scratch_shapes=scratch,
        ),
        compiler_params=pltpu.CompilerParams(
            dimension_semantics=("parallel", "parallel"),
            vmem_limit_bytes=48 * 1024 * 1024),
    )(xp, xp, w1, scale, shift, w2, b2)

    # Single output pass: drop junk columns + padded rows and return to NCHW.
    out = out.reshape(N, hp, wp, Cout)[:, :H, :W, :]
    return jnp.transpose(out, (0, 3, 1, 2))


def head_forward_convs0(x_nchw, w1x1, b1x1, *, tile_s=4096, compute_dtype=jnp.bfloat16):
    """Head with num_convs=0 (module default): a single 1x1 conv with bias.

    Computed directly in NCHW as (Cout, Cin) @ (Cin, S): no layout pass on input or
    output, unpadded channel dims, lane-dense spatial tiles."""
    N, Cin, H, W = x_nchw.shape
    Cout = w1x1.shape[0]
    S = H * W
    x = x_nchw.reshape(N, Cin, S)                 # free reshape, stays NCHW
    if S <= tile_s:
        tile_s = S
    else:
        tile_s = max(128, (tile_s // 128) * 128)  # lane-aligned; last block ragged
    num_s = -(-S // tile_s)

    w = w1x1.reshape(Cout, Cin).astype(compute_dtype)
    b = b1x1.astype(jnp.float32).reshape(Cout, 1)

    out = pl.pallas_call(
        _conv1x1_kernel,
        out_shape=jax.ShapeDtypeStruct((N, Cout, S), x_nchw.dtype),
        grid_spec=pltpu.PrefetchScalarGridSpec(
            num_scalar_prefetch=0,
            grid=(N, num_s),
            in_specs=[
                pl.BlockSpec((1, Cin, tile_s), lambda n, i: (n, 0, i)),
                pl.BlockSpec((Cout, Cin), lambda n, i: (0, 0)),
                pl.BlockSpec((Cout, 1), lambda n, i: (0, 0)),
            ],
            out_specs=pl.BlockSpec((1, Cout, tile_s), lambda n, i: (n, 0, i)),
        ),
        compiler_params=pltpu.CompilerParams(
            dimension_semantics=("parallel", "parallel"),
            vmem_limit_bytes=48 * 1024 * 1024),
    )(x, w, b)

    return out.reshape(N, Cout, H, W)


# ----------------------------- pure-JAX references ---------------------------

def _reference_convs1(x_nchw, w3x3, gamma, beta, mean, var, w1x1, b1x1,
                      eps=1e-5, compute_dtype=jnp.float32):
    x = jnp.transpose(x_nchw, (0, 2, 3, 1))
    k1 = jnp.transpose(w3x3, (2, 3, 1, 0))  # HWIO
    y = jax.lax.conv_general_dilated(
        x.astype(compute_dtype), k1.astype(compute_dtype), (1, 1), ((1, 1), (1, 1)),
        dimension_numbers=("NHWC", "HWIO", "NHWC"),
        preferred_element_type=jnp.float32)
    scale = gamma / jnp.sqrt(var + eps)
    y = jnp.maximum(y * scale + (beta - mean * scale), 0.0)
    k2 = jnp.transpose(w1x1, (2, 3, 1, 0))
    z = jax.lax.conv_general_dilated(
        y.astype(compute_dtype), k2.astype(compute_dtype), (1, 1), ((0, 0), (0, 0)),
        dimension_numbers=("NHWC", "HWIO", "NHWC"),
        preferred_element_type=jnp.float32) + b1x1
    return jnp.transpose(z, (0, 3, 1, 2))


def _reference_convs0(x_nchw, w1x1, b1x1, compute_dtype=jnp.float32):
    x = jnp.transpose(x_nchw, (0, 2, 3, 1))
    k = jnp.transpose(w1x1, (2, 3, 1, 0))
    z = jax.lax.conv_general_dilated(
        x.astype(compute_dtype), k.astype(compute_dtype), (1, 1), ((0, 0), (0, 0)),
        dimension_numbers=("NHWC", "HWIO", "NHWC"),
        preferred_element_type=jnp.float32) + b1x1
    return jnp.transpose(z, (0, 3, 1, 2))


# ----------------------------------- main ------------------------------------

if __name__ == "__main__":
    key = jax.random.PRNGKey(0)
    N, Cin, H, W = 2, 4, 16, 16
    Cinter, Cout = 8, 3
    ks = jax.random.split(key, 16)

    x = jax.random.normal(ks[0], (N, Cin, H, W), jnp.float32)

    # Deterministic synthetic parameters (PyTorch layouts: conv weight OIHW).
    w3x3 = 0.1 * jax.random.normal(ks[1], (Cinter, Cin, 3, 3), jnp.float32)
    gamma = 1.0 + 0.1 * jax.random.normal(ks[2], (Cinter,), jnp.float32)
    beta = 0.1 * jax.random.normal(ks[3], (Cinter,), jnp.float32)
    mean = 0.1 * jax.random.normal(ks[4], (Cinter,), jnp.float32)
    var = jnp.abs(jax.random.normal(ks[5], (Cinter,), jnp.float32)) + 0.5
    w1x1 = 0.1 * jax.random.normal(ks[6], (Cout, Cinter, 1, 1), jnp.float32)
    b1x1 = 0.1 * jax.random.normal(ks[7], (Cout,), jnp.float32)
    w1x1_direct = 0.1 * jax.random.normal(ks[8], (Cout, Cin, 1, 1), jnp.float32)

    # num_convs = 1 path, small Cin -> fused-tap (single K=9*Cin dot) branch.
    out1 = jax.block_until_ready(
        head_forward_convs1(x, w3x3, gamma, beta, mean, var, w1x1, b1x1))
    ref1_matched = _reference_convs1(x, w3x3, gamma, beta, mean, var, w1x1, b1x1,
                                     compute_dtype=jnp.bfloat16)
    ref1_f32 = _reference_convs1(x, w3x3, gamma, beta, mean, var, w1x1, b1x1,
                                 compute_dtype=jnp.float32)
    assert out1.shape == (N, Cout, H, W)
    assert jnp.allclose(out1, ref1_matched, atol=2e-3, rtol=2e-3)
    assert jnp.allclose(out1, ref1_f32, atol=5e-2, rtol=5e-2)

    # num_convs = 1 path, wider Cin -> per-tap-dot (unfused) branch.
    Cin2, Cinter2 = 80, 16
    x2 = jax.random.normal(ks[9], (1, Cin2, H, W), jnp.float32)
    w3x3_2 = 0.05 * jax.random.normal(ks[10], (Cinter2, Cin2, 3, 3), jnp.float32)
    gamma2 = 1.0 + 0.1 * jax.random.normal(ks[11], (Cinter2,), jnp.float32)
    beta2 = 0.1 * jax.random.normal(ks[12], (Cinter2,), jnp.float32)
    mean2 = 0.1 * jax.random.normal(ks[13], (Cinter2,), jnp.float32)
    var2 = jnp.abs(jax.random.normal(ks[14], (Cinter2,), jnp.float32)) + 0.5
    w1x1_2 = 0.1 * jax.random.normal(ks[15], (Cout, Cinter2, 1, 1), jnp.float32)
    out2 = jax.block_until_ready(
        head_forward_convs1(x2, w3x3_2, gamma2, beta2, mean2, var2, w1x1_2, b1x1))
    ref2_matched = _reference_convs1(x2, w3x3_2, gamma2, beta2, mean2, var2, w1x1_2,
                                     b1x1, compute_dtype=jnp.bfloat16)
    assert out2.shape == (1, Cout, H, W)
    assert jnp.allclose(out2, ref2_matched, atol=2e-2, rtol=2e-2)

    # num_convs = 0 path (module default: single 1x1 conv).
    out0 = jax.block_until_ready(head_forward_convs0(x, w1x1_direct, b1x1))
    ref0_matched = _reference_convs0(x, w1x1_direct, b1x1, compute_dtype=jnp.bfloat16)
    ref0_f32 = _reference_convs0(x, w1x1_direct, b1x1, compute_dtype=jnp.float32)
    assert out0.shape == (N, Cout, H, W)
    assert jnp.allclose(out0, ref0_matched, atol=2e-3, rtol=2e-3)
    assert jnp.allclose(out0, ref0_f32, atol=5e-2, rtol=5e-2)

    print("KERNEL_OK")
</pallas_src>

<mosaic_0001>
module attributes {stable_mosaic.version = 11 : i64} {
  func.func @_head_kernel_fused(%arg0: i32, %arg1: i32, %arg2: memref<1x144x4xbf16, #tpu.memory_space<vmem>>, %arg3: memref<1x72x4xbf16, #tpu.memory_space<vmem>>, %arg4: memref<36x8xbf16, #tpu.memory_space<vmem>>, %arg5: memref<1x8xf32, #tpu.memory_space<vmem>>, %arg6: memref<1x8xf32, #tpu.memory_space<vmem>>, %arg7: memref<8x3xbf16, #tpu.memory_space<vmem>>, %arg8: memref<1x3xf32, #tpu.memory_space<vmem>>, %arg9: memref<1x144x3xf32, #tpu.memory_space<vmem>>, %arg10: memref<216x4xbf16, #tpu.memory_space<vmem>>, %arg11: memref<144x36xbf16, #tpu.memory_space<vmem>>) attributes {dimension_semantics = [#tpu.dimension_semantics<parallel>, #tpu.dimension_semantics<parallel>], iteration_bounds = array<i64: 2, 2>, scalar_prefetch = 0 : i64, scratch_operands = 2 : i64, tpu.core_type = #tpu.core_type<tc>, window_params = [{transform_indices = @transform_0, window_bounds = array<i64: 1, 144, 4>}, {transform_indices = @transform_1, window_bounds = array<i64: 1, 72, 4>}, {pipeline_mode = #tpu.pipeline_mode<synchronous>, transform_indices = @transform_2, window_bounds = array<i64: 36, 8>}, {pipeline_mode = #tpu.pipeline_mode<synchronous>, transform_indices = @transform_3, window_bounds = array<i64: 1, 8>}, {pipeline_mode = #tpu.pipeline_mode<synchronous>, transform_indices = @transform_4, window_bounds = array<i64: 1, 8>}, {pipeline_mode = #tpu.pipeline_mode<synchronous>, transform_indices = @transform_5, window_bounds = array<i64: 8, 3>}, {pipeline_mode = #tpu.pipeline_mode<synchronous>, transform_indices = @transform_6, window_bounds = array<i64: 1, 3>}, {transform_indices = @transform_7, window_bounds = array<i64: 1, 144, 3>}]} {
    %c0 = arith.constant 0 : index
    %c0_0 = arith.constant 0 : index
    %c0_1 = arith.constant 0 : index
    %0 = vector.load %arg2[%c0, %c0_0, %c0_1] : memref<1x144x4xbf16, #tpu.memory_space<vmem>>, vector<1x144x4xbf16>
    %1 = vector.shape_cast %0 : vector<1x144x4xbf16> to vector<144x4xbf16>
    %c0_2 = arith.constant 0 : index
    %c0_3 = arith.constant 0 : index
    %2 = vector.load %arg10[%c0_2, %c0_3] : memref<216x4xbf16, #tpu.memory_space<vmem>>, vector<144x4xbf16>
    tpu.vector_store %arg10[%c0_2, %c0_3], %1 {strides = array<i32>} : memref<216x4xbf16, #tpu.memory_space<vmem>>, vector<144x4xbf16>,
    %c0_4 = arith.constant 0 : index
    %c0_5 = arith.constant 0 : index
    %c0_6 = arith.constant 0 : index
    %3 = vector.load %arg3[%c0_4, %c0_5, %c0_6] : memref<1x72x4xbf16, #tpu.memory_space<vmem>>, vector<1x72x4xbf16>
    %4 = vector.shape_cast %3 : vector<1x72x4xbf16> to vector<72x4xbf16>
    %c144 = arith.constant 144 : index
    %c0_7 = arith.constant 0 : index
    %5 = vector.load %arg10[%c144, %c0_7] : memref<216x4xbf16, #tpu.memory_space<vmem>>, vector<72x4xbf16>
    tpu.vector_store %arg10[%c144, %c0_7], %4 {strides = array<i32>} : memref<216x4xbf16, #tpu.memory_space<vmem>>, vector<72x4xbf16>,
    %c0_8 = arith.constant 0 : index
    %c0_9 = arith.constant 0 : index
    %6 = vector.load %arg10[%c0_8, %c0_9] : memref<216x4xbf16, #tpu.memory_space<vmem>>, vector<144x4xbf16>
    %c0_10 = arith.constant 0 : index
    %c0_11 = arith.constant 0 : index
    %7 = vector.load %arg11[%c0_10, %c0_11] : memref<144x36xbf16, #tpu.memory_space<vmem>>, vector<144x4xbf16>
    tpu.vector_store %arg11[%c0_10, %c0_11], %6 {strides = array<i32>} : memref<144x36xbf16, #tpu.memory_space<vmem>>, vector<144x4xbf16>,
    %c1 = arith.constant 1 : index
    %c0_12 = arith.constant 0 : index
    %8 = vector.load %arg10[%c1, %c0_12] : memref<216x4xbf16, #tpu.memory_space<vmem>>, vector<144x4xbf16>
    %c0_13 = arith.constant 0 : index
    %c4 = arith.constant 4 : index
    %9 = vector.load %arg11[%c0_13, %c4] : memref<144x36xbf16, #tpu.memory_space<vmem>>, vector<144x4xbf16>
    tpu.vector_store %arg11[%c0_13, %c4], %8 {strides = array<i32>} : memref<144x36xbf16, #tpu.memory_space<vmem>>, vector<144x4xbf16>,
    %c2 = arith.constant 2 : index
    %c0_14 = arith.constant 0 : index
    %10 = vector.load %arg10[%c2, %c0_14] : memref<216x4xbf16, #tpu.memory_space<vmem>>, vector<144x4xbf16>
    %c0_15 = arith.constant 0 : index
    %c8 = arith.constant 8 : index
    %11 = vector.load %arg11[%c0_15, %c8] : memref<144x36xbf16, #tpu.memory_space<vmem>>, vector<144x4xbf16>
    tpu.vector_store %arg11[%c0_15, %c8], %10 {strides = array<i32>} : memref<144x36xbf16, #tpu.memory_space<vmem>>, vector<144x4xbf16>,
    %c18 = arith.constant 18 : index
    %c0_16 = arith.constant 0 : index
    %12 = vector.load %arg10[%c18, %c0_16] : memref<216x4xbf16, #tpu.memory_space<vmem>>, vector<144x4xbf16>
    %c0_17 = arith.constant 0 : index
    %c12 = arith.constant 12 : index
    %13 = vector.load %arg11[%c0_17, %c12] : memref<144x36xbf16, #tpu.memory_space<vmem>>, vector<144x4xbf16>
    tpu.vector_store %arg11[%c0_17, %c12], %12 {strides = array<i32>} : memref<144x36xbf16, #tpu.memory_space<vmem>>, vector<144x4xbf16>,
    %c19 = arith.constant 19 : index
    %c0_18 = arith.constant 0 : index
    %14 = vector.load %arg10[%c19, %c0_18] : memref<216x4xbf16, #tpu.memory_space<vmem>>, vector<144x4xbf16>
    %c0_19 = arith.constant 0 : index
    %c16 = arith.constant 16 : index
    %15 = vector.load %arg11[%c0_19, %c16] : memref<144x36xbf16, #tpu.memory_space<vmem>>, vector<144x4xbf16>
    tpu.vector_store %arg11[%c0_19, %c16], %14 {strides = array<i32>} : memref<144x36xbf16, #tpu.memory_space<vmem>>, vector<144x4xbf16>,
    %c20 = arith.constant 20 : index
    %c0_20 = arith.constant 0 : index
    %16 = vector.load %arg10[%c20, %c0_20] : memref<216x4xbf16, #tpu.memory_space<vmem>>, vector<144x4xbf16>
    %c0_21 = arith.constant 0 : index
    %c20_22 = arith.constant 20 : index
    %17 = vector.load %arg11[%c0_21, %c20_22] : memref<144x36xbf16, #tpu.memory_space<vmem>>, vector<144x4xbf16>
    tpu.vector_store %arg11[%c0_21, %c20_22], %16 {strides = array<i32>} : memref<144x36xbf16, #tpu.memory_space<vmem>>, vector<144x4xbf16>,
    %c36 = arith.constant 36 : index
    %c0_23 = arith.constant 0 : index
    %18 = vector.load %arg10[%c36, %c0_23] : memref<216x4xbf16, #tpu.memory_space<vmem>>, vector<144x4xbf16>
    %c0_24 = arith.constant 0 : index
    %c24 = arith.constant 24 : index
    %19 = vector.load %arg11[%c0_24, %c24] : memref<144x36xbf16, #tpu.memory_space<vmem>>, vector<144x4xbf16>
    tpu.vector_store %arg11[%c0_24, %c24], %18 {strides = array<i32>} : memref<144x36xbf16, #tpu.memory_space<vmem>>, vector<144x4xbf16>,
    %c37 = arith.constant 37 : index
    %c0_25 = arith.constant 0 : index
    %20 = vector.load %arg10[%c37, %c0_25] : memref<216x4xbf16, #tpu.memory_space<vmem>>, vector<144x4xbf16>
    %c0_26 = arith.constant 0 : index
    %c28 = arith.constant 28 : index
    %21 = vector.load %arg11[%c0_26, %c28] : memref<144x36xbf16, #tpu.memory_space<vmem>>, vector<144x4xbf16>
    tpu.vector_store %arg11[%c0_26, %c28], %20 {strides = array<i32>} : memref<144x36xbf16, #tpu.memory_space<vmem>>, vector<144x4xbf16>,
    %c38 = arith.constant 38 : index
    %c0_27 = arith.constant 0 : index
    %22 = vector.load %arg10[%c38, %c0_27] : memref<216x4xbf16, #tpu.memory_space<vmem>>, vector<144x4xbf16>
    %c0_28 = arith.constant 0 : index
    %c32 = arith.constant 32 : index
    %23 = vector.load %arg11[%c0_28, %c32] : memref<144x36xbf16, #tpu.memory_space<vmem>>, vector<144x4xbf16>
    tpu.vector_store %arg11[%c0_28, %c32], %22 {strides = array<i32>} : memref<144x36xbf16, #tpu.memory_space<vmem>>, vector<144x4xbf16>,
    %c0_29 = arith.constant 0 : index
    %c0_30 = arith.constant 0 : index
    %24 = vector.load %arg11[%c0_29, %c0_30] : memref<144x36xbf16, #tpu.memory_space<vmem>>, vector<144x36xbf16>
    %c0_31 = arith.constant 0 : index
    %c0_32 = arith.constant 0 : index
    %25 = vector.load %arg4[%c0_31, %c0_32] : memref<36x8xbf16, #tpu.memory_space<vmem>>, vector<36x8xbf16>
    %cst = arith.constant dense<0.000000e+00> : vector<144x8xf32>
    %26 = tpu.matmul %24, %25, %cst {dimension_numbers = #tpu.dot_dimension_numbers<[1], [0], [0], [1], [0, 0, 1, 1], [], []>} : vector<144x36xbf16>, vector<36x8xbf16>, vector<144x8xf32> -> vector<144x8xf32>
    %c0_33 = arith.constant 0 : index
    %c0_34 = arith.constant 0 : index
    %27 = vector.load %arg5[%c0_33, %c0_34] : memref<1x8xf32, #tpu.memory_space<vmem>>, vector<1x8xf32>
    %28 = vector.broadcast %27 : vector<1x8xf32> to vector<144x8xf32>
    %29 = arith.mulf %26, %28 : vector<144x8xf32>
    %c0_35 = arith.constant 0 : index
    %c0_36 = arith.constant 0 : index
    %30 = vector.load %arg6[%c0_35, %c0_36] : memref<1x8xf32, #tpu.memory_space<vmem>>, vector<1x8xf32>
    %31 = vector.broadcast %30 : vector<1x8xf32> to vector<144x8xf32>
    %32 = arith.addf %29, %31 : vector<144x8xf32>
    %cst_37 = arith.constant 0.000000e+00 : f32
    %33 = vector.broadcast %cst_37 : f32 to vector<144x8xf32>
    %34 = arith.maximumf %32, %33 : vector<144x8xf32>
    %35 = arith.truncf %34 : vector<144x8xf32> to vector<144x8xbf16>
    %c0_38 = arith.constant 0 : index
    %c0_39 = arith.constant 0 : index
    %36 = vector.load %arg7[%c0_38, %c0_39] : memref<8x3xbf16, #tpu.memory_space<vmem>>, vector<8x3xbf16>
    %cst_40 = arith.constant dense<0.000000e+00> : vector<144x3xf32>
    %37 = tpu.matmul %35, %36, %cst_40 {dimension_numbers = #tpu.dot_dimension_numbers<[1], [0], [0], [1], [0, 0, 1, 1], [], []>} : vector<144x8xbf16>, vector<8x3xbf16>, vector<144x3xf32> -> vector<144x3xf32>
    %c0_41 = arith.constant 0 : index
    %c0_42 = arith.constant 0 : index
    %38 = vector.load %arg8[%c0_41, %c0_42] : memref<1x3xf32, #tpu.memory_space<vmem>>, vector<1x3xf32>
    %39 = vector.broadcast %38 : vector<1x3xf32> to vector<144x3xf32>
    %40 = arith.addf %37, %39 : vector<144x3xf32>
    %c0_43 = arith.constant 0 : index
    %c0_44 = arith.constant 0 : index
    %c0_45 = arith.constant 0 : index
    %41 = vector.load %arg9[%c0_43, %c0_44, %c0_45] : memref<1x144x3xf32, #tpu.memory_space<vmem>>, vector<1x144x3xf32>
    %42 = vector.shape_cast %41 : vector<1x144x3xf32> to vector<144x3xf32>
    %43 = vector.shape_cast %40 : vector<144x3xf32> to vector<1x144x3xf32>
    tpu.vector_store %arg9[%c0_43, %c0_44, %c0_45], %43 {strides = array<i32>} : memref<1x144x3xf32, #tpu.memory_space<vmem>>, vector<1x144x3xf32>,
    return
  }
  func.func @transform_0(%arg0: i32, %arg1: i32) -> (i32, i32, i32) {
    %c0_i32 = arith.constant 0 : i32
    %c0_i32_0 = arith.constant 0 : i32
    return %arg0, %arg1, %c0_i32 : i32, i32, i32
  }
  func.func @transform_1(%arg0: i32, %arg1: i32) -> (i32, i32, i32) {
    %c1_i32 = arith.constant 1 : i32
    %0 = arith.addi %arg1, %c1_i32 : i32
    %c2_i32 = arith.constant 2 : i32
    %1 = arith.muli %0, %c2_i32 : i32
    %c0_i32 = arith.constant 0 : i32
    %c0_i32_0 = arith.constant 0 : i32
    return %arg0, %1, %c0_i32 : i32, i32, i32
  }
  func.func @transform_2(%arg0: i32, %arg1: i32) -> (i32, i32) {
    %c0_i32 = arith.constant 0 : i32
    %c0_i32_0 = arith.constant 0 : i32
    %c0_i32_1 = arith.constant 0 : i32
    return %c0_i32, %c0_i32_0 : i32, i32
  }
  func.func @transform_3(%arg0: i32, %arg1: i32) -> (i32, i32) {
    %c0_i32 = arith.constant 0 : i32
    %c0_i32_0 = arith.constant 0 : i32
    %c0_i32_1 = arith.constant 0 : i32
    return %c0_i32, %c0_i32_0 : i32, i32
  }
  func.func @transform_4(%arg0: i32, %arg1: i32) -> (i32, i32) {
    %c0_i32 = arith.constant 0 : i32
    %c0_i32_0 = arith.constant 0 : i32
    %c0_i32_1 = arith.constant 0 : i32
    return %c0_i32, %c0_i32_0 : i32, i32
  }
  func.func @transform_5(%arg0: i32, %arg1: i32) -> (i32, i32) {
    %c0_i32 = arith.constant 0 : i32
    %c0_i32_0 = arith.constant 0 : i32
    %c0_i32_1 = arith.constant 0 : i32
    return %c0_i32, %c0_i32_0 : i32, i32
  }
  func.func @transform_6(%arg0: i32, %arg1: i32) -> (i32, i32) {
    %c0_i32 = arith.constant 0 : i32
    %c0_i32_0 = arith.constant 0 : i32
    %c0_i32_1 = arith.constant 0 : i32
    return %c0_i32, %c0_i32_0 : i32, i32
  }
  func.func @transform_7(%arg0: i32, %arg1: i32) -> (i32, i32, i32) {
    %c0_i32 = arith.constant 0 : i32
    %c0_i32_0 = arith.constant 0 : i32
    return %arg0, %arg1, %c0_i32 : i32, i32, i32
  }
}

</mosaic_0001>

<bundles_post_ra>
// kernel: tpu_custom_call.1
= control target key start
LH: loop header
LB: loop body
LE: loop exit
PB: predicated region body
PF: predicated region fallthrough
CT: control target
= control target key end

     0   :  { %s2865_s24 = smov 0   ;;  %s2867_s25 = smov 0   ;;  %s4174_s0 = inlined_call_operand.vmem [shape: bf16[2,360,4], index: 0, kind: input, shape index: {}]   ;;  %s4175_s1 = inlined_call_operand.vmem [shape: bf16[2,360,4], index: 1, kind: input, shape index: {}]   ;;  %s4176_s2 = inlined_call_operand.vmem [shape: bf16[36,8], index: 2, kind: input, shape index: {}]   ;;  %s4177_s3 = inlined_call_operand.vmem [shape: f32[1,8], index: 3, kind: input, shape index: {}]   ;;  %s4178_s4 = inlined_call_operand.vmem [shape: f32[1,8], index: 4, kind: input, shape index: {}]   ;;  %s4179_s5 = inlined_call_operand.vmem [shape: bf16[8,3], index: 5, kind: input, shape index: {}]   ;;  %s4180_s6 = inlined_call_operand.vmem [shape: f32[1,3], index: 6, kind: input, shape index: {}]   ;;  %s4181_s7 = inlined_call_operand.vmem [shape: f32[2,288,3], index: 7, kind: output, shape index: {}]  }
   0x1   :  { %s2869_s26 = smov 0   ;;  %s2871_s27 = smov 0  }
   0x2   :  { %s2873_s28 = smov 0  }
   0x3 LB: > { %s26_s29 = sadd.s32 1, %s2807_s26  ;;  %s29_s30 = sadd.s32 1, %s2811_s27  ;;  %s2815_s28 = sphi %s2873_s28, %s17_s28   ;;  %s2811_s27 = sphi %s2871_s27, %s4205_s27   ;;  %s2807_s26 = sphi %s2869_s26, %s4204_s26   ;;  %s2803_s25 = sphi %s2867_s25, %s4203_s25   ;;  %s2799_s24 = sphi %s2865_s24, %s4202_s24  }
   0x4   : > { %p27_p0 = scmp.ge.s32.totalorder %s26_s29, 2  ;;  %p2628_p1 = scmp.ge.s32.totalorder %s2815_s28, 1 }
   0x5   : > { %p291_p2 = scmp.lt.s32.totalorder %s2815_s28, 5 }
   0x6   : > { %s4207_s29 = smov (%p27_p0, %s26_s29), 0  ;;  %s4209_s30 = smov (!%p27_p0, %s29_s30), %s2811_s27 }
   0x7   : > { %p292_p3 = pnand %p2628_p1, %p291_p2  ;;  %p31_p4 = scmp.ge.s32.totalorder %s4209_s30, 2 }
   0x8   : > { %s2898_s8 = smul.u32 (!%p292_p3), 18, %s2799_s24  ;;  %p351_p5 = scmp.lt.s32.totalorder (!%p292_p3), %s2803_s25, 1 }
   0x9   : > { %s4211_s30 = smov (%p31_p4, %s4209_s30), 0  ;;  %295 = sbr.rel (%p292_p3) target bundleno = 820 (0x334), region = 48 }
   0xa   : > { %p353_p6 = scmp.lt.s32.totalorder (!%p292_p3), %s2898_s8, 44  ;;  %s2817_s16 = smov (!%p292_p3), 4  }
   0xb   : > { %s2818_s17 = smov (!%p292_p3), 8   ;;  %s2819_s18 = smov (!%p292_p3), 16  }
   0xc   : > { %s2820_s19 = smov (!%p292_p3), 12   ;;  %s2821_s20 = smov (!%p292_p3), 20  }
   0xd   : > { %s2822_s21 = smov (!%p292_p3), 24   ;;  %s2823_s22 = smov (!%p292_p3), 28  }
   0xe   : > { %s4213_s25 = smov (!%p351_p5, %s2803_s25), 1  ;;  %vm407_vm0 = vcmask 27648   ;;  %vm499_vm1 = vsmask.f32 3328  ;;  %vm500_vm2 = vsmask.f32 7440 }
   0xf   : > { %s2724_s9 = smul.u32 45, %s4213_s25  ;;  %vm2937_vm3 = vmor %vm499_vm1, %vm500_vm2  ;;  %vm797_vm4 = vcmask 1042432   ;;  %vm798_vm5 = vcmask 1046532   ;;  %vm1113_vm7 = vsmask.f32 2304  ;;  %vm1415_vm10 = vcmask 1041408  }
  0x10   : > { %s354_s10 = scalar_select %p353_p6, %s2898_s8, 44  ;;  %vm2996_vm6 = vmor %vm797_vm4, %vm798_vm5  ;;  %vm1114_vm8 = vsmask.f32 6416  ;;  %vm1416_vm11 = vcmask 1045508   ;;  %vm1731_vm13 = vsmask.f32 1280 }
  0x11   : > { %vm3017_vm9 = vmor %vm1113_vm7, %vm1114_vm8  ;;  %vm1732_vm14 = vsmask.f32 5392  ;;  %vm2033_vm1 = vcmask 1040384   ;;  %vm2034_vm2 = vcmask 1044484   ;;  %s2824_s23 = smov 32   ;;  %vm740_vm5 = vcmask 60448  }
  0x12   : > { %s356_s11 = sadd.s32 %s2724_s9, %s354_s10  ;;  %vm3038_vm12 = vmor %vm1415_vm10, %vm1416_vm11  ;;  %s364_s10 = sadd.s32 1, %s2799_s24  ;;  %vm909_vm7 = vcmask 93248   ;;  %vm1075_vm8 = vcmask 126048   ;;  %vm1358_vm11 = vcmask 158848  }
  0x13   : > { %s2629_s12 = sshll.u32 %s356_s11, 2  ;;  %vm3115_vm15 = vmor %vm1731_vm13, %vm1732_vm14  ;;  %s2631_s24 = smul.u32 18, %s364_s10  ;;  %vm1527_vm13 = vcmask 191648   ;;  %vm1693_vm14 = vcmask 224448  }
  0x14   : > { %s2910_s15 = scalar_lea.vmem %s4174_s0, %s2629_s12  ;;  %vm3133_vm4 = vmor %vm2033_vm1, %vm2034_vm2  ;;  %vm2145_vm1 = vcmask 290048   ;;  %vm2247_vm2 = vcmask 293888   ;;  %p381_p8 = scmp.lt.s32.totalorder %s2898_s8, 35 }
  0x15   : > { %v391_v0 = vld [vmem:[%s2910_s15 + $0x8] sm:$0xf]  ;;  %v392_v1 = vld [vmem:[%s2910_s15 + $0xc] sm:$0xf]  ;;  %v389_v2 = vld [vmem:[%s2910_s15] sm:$0xf] }
  0x16   : > { %410 = vst.msk [vmem:[#allocation2 + $0x8] sm:$0xf] %vm407_vm0, %v391_v0  ;;  %v390_v3 = vld [vmem:[%s2910_s15 + $0x4] sm:$0xf]  ;;  %v393_v4 = vld [vmem:[%s2910_s15 + $0x10] sm:$0xf] }
  0x17   : > { %411 = vst.msk [vmem:[#allocation2 + $0xc] sm:$0xf] %vm407_vm0, %v392_v1  ;;  %v396_v5 = vld [vmem:[%s2910_s15 + $0x1c] sm:$0xf]  ;;  %v397_v6 = vld [vmem:[%s2910_s15 + $0x20] sm:$0xf] }
  0x18   : > { %408 = vst.msk [vmem:[#allocation2] sm:$0xf] %vm407_vm0, %v389_v2  ;;  %v395_v7 = vld [vmem:[%s2910_s15 + $0x18] sm:$0xf]  ;;  %v399_v8 = vld [vmem:[%s2910_s15 + $0x28] sm:$0xf] }
  0x19   : > { %409 = vst.msk [vmem:[#allocation2 + $0x4] sm:$0xf] %vm407_vm0, %v390_v3  ;;  %v400_v9 = vld [vmem:[%s2910_s15 + $0x2c] sm:$0xf]  ;;  %v398_v41 = vld [vmem:[%s2910_s15 + $0x24] sm:$0xf] }
  0x1a   : > { %412 = vst.msk [vmem:[#allocation2 + $0x10] sm:$0xf] %vm407_vm0, %v393_v4  ;;  %v394_v42 = vld [vmem:[%s2910_s15 + $0x14] sm:$0xf]  ;;  %p369_p7 = scmp.lt.s32.totalorder %s2631_s24, 44  ;;  %s4217_s8 = smov (!%p381_p8, %s2898_s8), 35 }
  0x1b   : > { %415 = vst.msk [vmem:[#allocation2 + $0x1c] sm:$0xf] %vm407_vm0, %v396_v5 }
  0x1c   : > { %416 = vst.msk [vmem:[#allocation2 + $0x20] sm:$0xf] %vm407_vm0, %v397_v6  ;;  %s4215_s24 = smov (!%p369_p7, %s2631_s24), 44 }
  0x1d   : > { %v482_v10 = vld [vmem:[#allocation2 + $0x8] sm:$0xf]  ;;  %414 = vst.msk [vmem:[#allocation2 + $0x18] sm:$0xf] %vm407_vm0, %v395_v7  ;;  %s372_s11 = sadd.s32 %s2724_s9, %s4215_s24 }
  0x1e   : > { %v483_v11 = vld [vmem:[#allocation2 + $0xc] sm:$0xf]  ;;  %v522_v12 = vshll.u32 %v482_v10, 16  ;;  %v526_v13 = vshrl.u32 %v482_v10, 16  ;;  %418 = vst.msk [vmem:[#allocation2 + $0x28] sm:$0xf] %vm407_vm0, %v399_v8 }
  0x1f   : > { %v532_v14 = vshll.u32 %v483_v11, 16  ;;  %v536_v15 = vshrl.u32 %v483_v11, 16  ;;  %v480_v16 = vld [vmem:[#allocation2] sm:$0xf]  ;;  %419 = vst.msk [vmem:[#allocation2 + $0x2c] sm:$0xf] %vm407_vm0, %v400_v9 }
  0x20   : > { %v2932_v17 = vrot.slane %v522_v12, 5  ;;  %v528_v18 = vrot.slane %v526_v13, 4  ;;  %v481_v19 = vld [vmem:[#allocation2 + $0x4] sm:$0xf]  ;;  %v503_v20 = vshrl.u32 %v480_v16, 16  ;;  %v506_v21 = vshll.u32 %v480_v16, 16 }
  0x21   : > { %v538_v22 = vrot.slane %v536_v15, 4  ;;  %v512_v23 = vshll.u32 %v481_v19, 16  ;;  %v516_v24 = vshrl.u32 %v481_v19, 16  ;;  %v484_v25 = vld [vmem:[#allocation2 + $0x10] sm:$0xf]  ;;  %v534_v27 = vrot.slane %v532_v14, 5 }
  0x22   : > { %v529_v26 = vor.u32 %v528_v18, %v2932_v17  ;;  %v505_v28 = vrot.slane %v503_v20, 4  ;;  %v508_v29 = vrot.slane %v506_v21, 5  ;;  %v487_v30 = vld [vmem:[#allocation2 + $0x1c] sm:$0xf]  ;;  %v542_v34 = vshll.u32 %v484_v25, 16  ;;  %s2632_s12 = sshll.u32 %s372_s11, 2 }
  0x23   : > { %v514_v32 = vrot.slane %v512_v23, 5  ;;  %v518_v33 = vrot.slane %v516_v24, 4  ;;  %v572_v35 = vshll.u32 %v487_v30, 16  ;;  %v539_v38 = vor.u32 %v538_v22, %v534_v27  ;;  %v488_v46 = vld [vmem:[#allocation2 + $0x20] sm:$0xf]  ;;  %s3307_s14 = scalar_lea.vmem %s4175_s1, %s2632_s12 }
  0x24   : > { %v530_v36 = vrot.slane %v529_v26, 4  ;;  %v509_v37 = vor.u32 %v508_v29, %v505_v28  ;;  %v576_v39 = vshrl.u32 %v487_v30, 16  ;;  %v486_v40 = vld [vmem:[#allocation2 + $0x18] sm:$0xf]  ;;  %417 = vst.msk [vmem:[#allocation2 + $0x24] sm:$0xf] %vm407_vm0, %v398_v41 }
  0x25   : > { %v519_v45 = vor.u32 %v518_v33, %v514_v32  ;;  %v574_v47 = vrot.slane %v572_v35, 5  ;;  %v562_v49 = vshll.u32 %v486_v40, 16  ;;  %v540_v51 = vrot.slane %v539_v38, 4  ;;  %413 = vst.msk [vmem:[#allocation2 + $0x14] sm:$0xf] %vm407_vm0, %v394_v42 }
  0x26   : > { %v535_v43 = vsel %vm2937_vm3, %v530_v36, %v534_v27  ;;  %v510_v44 = vrot.slane %v509_v37, 4  ;;  %v578_v48 = vrot.slane %v576_v39, 4  ;;  %v544_v52 = vrot.slane %v542_v34, 5  ;;  %v490_v55 = vld [vmem:[#allocation2 + $0x28] sm:$0xf] }
  0x27   : > { %690 = vrot.lane.b32.xlu1 %v535_v43, %s2817_s16  ;;  %v566_v53 = vshrl.u32 %v486_v40, 16  ;;  %v2951_v54 = vrot.slane %v562_v49, 5  ;;  %v520_v56 = vrot.slane %v519_v45, 4  ;;  %v582_v57 = vshll.u32 %v488_v46, 16  ;;  %v491_v4 = vld [vmem:[#allocation2 + $0x2c] sm:$0xf] }
  0x28   : > { %v515_v50 = vsel %vm2937_vm3, %v510_v44, %v514_v32  ;;  %v579_v59 = vor.u32 %v578_v48, %v574_v47  ;;  %v546_v60 = vshrl.u32 %v484_v25, 16  ;;  %v545_v61 = vsel %vm2937_vm3, %v540_v51, %v544_v52  ;;  %v401_v15 = vld [vmem:[%s2910_s15 + $0x30] sm:$0xf]  ;;  %v760_v35 = vld [vmem:[#allocation2 + $0x4] sm:$0xf] }
  0x29   : > { %686 = vrot.lane.b32.xlu0 %v515_v50, %s2817_s16  ;;  %v568_v58 = vrot.slane %v566_v53, 4  ;;  %v602_v62 = vshll.u32 %v490_v55, 16  ;;  %v606_v63 = vshrl.u32 %v490_v55, 16  ;;  %v525_v2 = vsel %vm2937_vm3, %v520_v56, %v2932_v17  ;;  %420 = vst.msk [vmem:[#allocation2 + $0x30] sm:$0xf] %vm407_vm0, %v401_v15 }
  0x2a   : > { %v548_v1 = vrot.slane %v546_v60, 4  ;;  %v584_v3 = vrot.slane %v582_v57, 5  ;;  %v580_v6 = vrot.slane %v579_v59, 4  ;;  %v586_v22 = vshrl.u32 %v488_v46, 16  ;;  %v1094_v36 = vld [vmem:[#allocation2 + $0x8] sm:$0xe] }
  0x2b   : > { %v569_v0 = vor.u32 %v568_v58, %v2951_v54  ;;  %v489_v5 = vld [vmem:[#allocation2 + $0x24] sm:$0xf]  ;;  %v604_v11 = vrot.slane %v602_v62, 5  ;;  %v608_v12 = vrot.slane %v606_v63, 4  ;;  %v612_v23 = vshll.u32 %v491_v4, 16 }
  0x2c   : > { %v592_v7 = vshll.u32 %v489_v5, 16  ;;  %v596_v8 = vshrl.u32 %v489_v5, 16  ;;  %v485_v9 = vld [vmem:[#allocation2 + $0x14] sm:$0xf]  ;;  %v549_v10 = vor.u32 %v548_v1, %v544_v52  ;;  %v585_v24 = vsel %vm2937_vm3, %v580_v6, %v584_v3  ;;  %v2980_v43 = vld [vmem:[#allocation2 + $0x8] sm:$0xf] }
  0x2d   : > { %v552_v13 = vshll.u32 %v485_v9, 16  ;;  %v556_v14 = vshrl.u32 %v485_v9, 16  ;;  %v570_v16 = vrot.slane %v569_v0, 4  ;;  %v609_v25 = vor.u32 %v608_v12, %v604_v11  ;;  %v402_v46 = vld [vmem:[%s2910_s15 + $0x34] sm:$0xf] }
  0x2e   : > { %v550_v18 = vrot.slane %v549_v10, 4  ;;  %v2962_v17 = vrot.slane %v592_v7, 5  ;;  %v598_v19 = vrot.slane %v596_v8, 4  ;;  %v588_v32 = vrot.slane %v586_v22, 4  ;;  %v403_v48 = vld [vmem:[%s2910_s15 + $0x38] sm:$0xf] }
  0x2f   : > { %692 = vrot.lane.b32.xlu1 %v545_v61, %s2817_s16  ;;  %v554_v20 = vrot.slane %v552_v13, 5  ;;  %v558_v21 = vrot.slane %v556_v14, 4  ;;  %v575_v28 = vsel %vm2937_vm3, %v570_v16, %v574_v47  ;;  %v610_v33 = vrot.slane %v609_v25, 4  ;;  %v1095_v47 = vld [vmem:[#allocation2 + $0xc] sm:$0xf] }
  0x30   : > { %v599_v29 = vor.u32 %v598_v19, %v2962_v17  ;;  %v614_v34 = vrot.slane %v612_v23, 5  ;;  %v616_v37 = vshrl.u32 %v491_v4, 16  ;;  %v589_v40 = vor.u32 %v588_v32, %v584_v3  ;;  %v759_v50 = vld [vmem:[#allocation2] sm:$0xe]  ;;  %v2989_v55 = vld [vmem:[#allocation2 + $0x30] sm:$0xf] }
  0x31   : > { %688 = vrot.lane.b32.xlu0 %v525_v2, %s2817_s16  ;;  %v555_v26 = vsel %vm2937_vm3, %v550_v18, %v554_v20  ;;  %v559_v27 = vor.u32 %v558_v21, %v554_v20  ;;  %v802_v41 = vrot.slane %v760_v35, 5  ;;  %v1117_v44 = vshrl.u32 %v1094_v36, 16  ;;  %421 = vst.msk [vmem:[#allocation2 + $0x34] sm:$0xf] %vm407_vm0, %v402_v46  ;;  %v929_v62 = vld [vmem:[#allocation2 + $0xc] sm:$0xf] }
  0x32   : > { %694 = vrot.lane.b32.xlu2 %v555_v26, %s2817_s16  ;;  %v600_v38 = vrot.slane %v599_v29, 4  ;;  %v615_v42 = vsel %vm2937_vm3, %v610_v33, %v614_v34  ;;  %v1120_v45 = vshll.u32 %v1094_v36, 16  ;;  %v590_v51 = vrot.slane %v589_v40, 4  ;;  %422 = vst.msk [vmem:[#allocation2 + $0x38] sm:$0xf] %vm407_vm0, %v403_v48 }
  0x33   : > { %v560_v30 = vrot.slane %v559_v27, 4  ;;  %v618_v52 = vrot.slane %v616_v37, 4  ;;  %v804_v53 = vrot.slane %v802_v41, 4  ;;  %v1119_v56 = vrot.slane %v1117_v44, 5  ;;  %v3011_v8 = vld [vmem:[#allocation2 + $0x10] sm:$0xf] }
  0x34   : > { %v605_v49 = vsel %vm2937_vm3, %v600_v38, %v604_v11  ;;  %v1122_v57 = vrot.slane %v1120_v45, 6  ;;  %v1126_v58 = vshrl.u32 %v1095_v47, 16  ;;  %v1129_v59 = vshll.u32 %v1095_v47, 16  ;;  %v1378_v16 = vld [vmem:[#allocation2 + $0xc] sm:$0xf] }
  0x35   : > { %v565_v39 = vsel %vm2937_vm3, %v560_v30, %v2951_v54  ;;  %v805_v54 = vrot.slane %v2980_v43, 5  ;;  %v2634_v61 = vrot.slane %v759_v50, 9  ;;  %v595_v63 = vsel %vm2937_vm3, %v590_v51, %v2962_v17  ;;  %v928_v17 = vld [vmem:[#allocation2 + $0x8] sm:$0xe]  ;;  %v1096_v19 = vld [vmem:[#allocation2 + $0x10] sm:$0xf] }
  0x36   : > { %v619_v0 = vor.u32 %v618_v52, %v614_v34  ;;  %v622_v1 = vshll.u32 %v2989_v55, 16  ;;  %v1123_v3 = vor.u32 %v1122_v57, %v1119_v56  ;;  %v1128_v4 = vrot.slane %v1126_v58, 5  ;;  %v3031_v23 = vld [vmem:[#allocation2 + $0x10] sm:$0xf]  ;;  %v1377_v27 = vld [vmem:[#allocation2 + $0x8] sm:$0xc] }
  0x37   : > { %700 = vrot.lane.b32.xlu1 %v585_v24, %s2817_s16  ;;  %v806_v2 = vsel %vm2996_vm6, %v804_v53, %v805_v54  ;;  %v1131_v5 = vrot.slane %v1129_v59, 6  ;;  %v968_v6 = vrot.slane %v929_v62, 5  ;;  %v803_v7 = vsel %vm2996_vm6, %v2634_v61, %v802_v41  ;;  %v770_v36 = vld [vmem:[#allocation2 + $0x2c] sm:$0xf]  ;;  %v1546_v38 = vld [vmem:[#allocation2 + $0x10] sm:$0xc] }
  0x38   : > { %v620_v9 = vrot.slane %v619_v0, 4  ;;  %v3013_v10 = vrot.slane %v622_v1, 5  ;;  %v1124_v11 = vrot.slane %v1123_v3, 4  ;;  %v971_v15 = vrot.slane %v3011_v8, 5  ;;  %v404_v40 = vld [vmem:[%s2910_s15 + $0x3c] sm:$0xf] }
  0x39   : > { %698 = vrot.lane.b32.xlu0 %v575_v28, %s2817_s16  ;;  %v1132_v12 = vor.u32 %v1131_v5, %v1128_v4  ;;  %v970_v14 = vrot.slane %v968_v6, 4  ;;  %v1420_v21 = vrot.slane %v1378_v16, 6  ;;  %v2635_v24 = vrot.slane %v928_v17, 9  ;;  %423 = vst.msk [vmem:[#allocation2 + $0x3c] sm:$0xf] %vm407_vm0, %v404_v40 }
  0x3a   : > { %696 = vrot.lane.b32.xlu2 %v565_v39, %s2817_s16  ;;  %v625_v18 = vsel %vm2937_vm3, %v620_v9, %v3013_v10  ;;  %v1136_v25 = vshrl.u32 %v1096_v19, 16  ;;  %v1139_v26 = vshll.u32 %v1096_v19, 16  ;;  %v1423_v29 = vrot.slane %v3031_v23, 6  ;;  %v3048_v39 = vld [vmem:[#allocation2 + $0x14] sm:$0xf] }
  0x3b   : > { %v1133_v20 = vsel %vm3017_vm9, %v1124_v11, %v1132_v12  ;;  %v972_v22 = vsel %vm2996_vm6, %v970_v14, %v971_v15  ;;  %v1422_v28 = vrot.slane %v1420_v21, 4  ;;  %v2636_v32 = vrot.slane %v1377_v27, 10  ;;  %v3060_v47 = vld [vmem:[#allocation2 + $0x28] sm:$0xf]  ;;  %v939_v50 = vld [vmem:[#allocation2 + $0x34] sm:$0xf] }
  0x3c   : > { %v969_v33 = vsel %vm2996_vm6, %v2635_v24, %v968_v6  ;;  %v1138_v34 = vrot.slane %v1136_v25, 5  ;;  %v1141_v35 = vrot.slane %v1139_v26, 6  ;;  %v832_v44 = vrot.slane %v770_v36, 5  ;;  %v3063_v51 = vld [vmem:[#allocation2 + $0x30] sm:$0xf] }
  0x3d   : > { %v1424_v37 = vsel %vm3038_vm12, %v1422_v28, %v1423_v29  ;;  %v1421_v41 = vsel %vm3038_vm12, %v2636_v32, %v1420_v21  ;;  %v1134_v45 = vrot.slane %v1132_v12, 4  ;;  %v2637_v48 = vrot.slane %v1546_v38, 10  ;;  %v1104_v53 = vld [vmem:[#allocation2 + $0x30] sm:$0xf]  ;;  %v405_v56 = vld [vmem:[%s2910_s15 + $0x40] sm:$0xf] }
  0x3e   : > { %v3056_v46 = vor.u32 %v1141_v35, %v1138_v34  ;;  %v834_v57 = vrot.slane %v832_v44, 4  ;;  %v1713_v59 = vld [vmem:[#allocation2 + $0x14] sm:$0xf]  ;;  %v4185_v61 = vrot.slane %v3060_v47, 5  ;;  %424 = vst.msk [vmem:[#allocation2 + $0x40] sm:$0xf] %vm407_vm0, %v405_v56 }
  0x3f   : > { %706 = vrot.lane.b32.xlu1 %v615_v42, %s2817_s16  ;;  %v3054_v42 = vld [vmem:[#allocation2 + $0x30] sm:$0xf]  ;;  %v998_v62 = vrot.slane %v939_v50, 5  ;;  %v3076_v1 = vld [vmem:[#allocation2 + $0x38] sm:$0xf]  ;;  %v1219_v3 = vshll.u32 %v1104_v53, 16 }
  0x40   : > { %v835_v52 = vrot.slane %v3054_v42, 5  ;;  %v1143_v58 = vsel %vm3017_vm9, %v1134_v45, %v3056_v46  ;;  %v1105_v4 = vld [vmem:[#allocation2 + $0x34] sm:$0xf]  ;;  %v1744_v5 = vshrl.u32 %v1713_v59, 16  ;;  %v1747_v6 = vshll.u32 %v1713_v59, 16 }
  0x41   : > { %704 = vrot.lane.b32.xlu0 %v605_v49, %s2817_s16  ;;  %v1586_v49 = vrot.slane %v3048_v39, 6  ;;  %v1714_v9 = vld [vmem:[#allocation2 + $0x18] sm:$0xf]  ;;  %v831_v11 = vrot.slane %v4185_v61, 4  ;;  %v1000_v12 = vrot.slane %v998_v62, 4  ;;  %v1001_v14 = vrot.slane %v3076_v1, 5 }
  0x42   : > { %702 = vrot.lane.b32.xlu2 %v595_v63, %s2817_s16  ;;  %v995_v63 = vrot.slane %v3063_v51, 5  ;;  %v1221_v19 = vrot.slane %v1219_v3, 6  ;;  %v1229_v21 = vshll.u32 %v1105_v4, 16  ;;  %v1749_v24 = vrot.slane %v1747_v6, 7  ;;  %v450_v43 = vld [vmem:[#allocation2 + $0x18] sm:$0xf] }
  0x43   : > { %v1587_v0 = vsel %vm3038_vm12, %v2637_v48, %v1586_v49  ;;  %v1754_v25 = vshrl.u32 %v1714_v9, 16  ;;  %v1757_v26 = vshll.u32 %v1714_v9, 16  ;;  %v833_v27 = vsel %vm2996_vm6, %v831_v11, %v832_v44  ;;  %468 = vst.msk [vmem:[#allocation3 + $0x18] sm:$0xf] %vm407_vm0, %v450_v43  ;;  %v455_v8 = vld [vmem:[#allocation2 + $0x2c] sm:$0xf] }
  0x44   : > { %v997_v16 = vrot.slane %v995_v63, 4  ;;  %v1002_v34 = vsel %vm2996_vm6, %v1000_v12, %v1001_v14  ;;  %v1588_v44 = vrot.slane %v1586_v49, 4  ;;  %473 = vst.msk [vmem:[#allocation3 + $0x2c] sm:$0xf] %vm407_vm0, %v455_v8  ;;  %v406_v23 = vld [vmem:[%s2910_s15 + $0x44] sm:$0xf] }
  0x45   : > { %v1756_v40 = vrot.slane %v1754_v25, 6  ;;  %v1722_v25 = vld [vmem:[#allocation2 + $0x38] sm:$0xf]  ;;  %425 = vst.msk [vmem:[#allocation2 + $0x44] sm:$0xf] %vm407_vm0, %v406_v23 }
  0x46   : > { %v999_v38 = vsel %vm2996_vm6, %v997_v16, %v998_v62  ;;  %v3345_v61 = vld [vmem:[#allocation2 + $0x20] sm:$0xf]  ;;  %v2004_v13 = vld [vmem:[#allocation2 + $0x34] sm:$0xf] }
  0x47   : > { %857 = vrot.lane.b32.xlu1 %v806_v2, %s2818_s17  ;;  %v1216_v2 = vshrl.u32 %v1104_v53, 16 }
  0x49   : > { %855 = vrot.lane.b32.xlu0 %v803_v7, %s2818_s17  ;;  %v836_v7 = vsel %vm2996_vm6, %v834_v57, %v835_v52  ;;  %v1218_v17 = vrot.slane %v1216_v2, 5  ;;  %v1996_v57 = vld [vmem:[#allocation2 + $0x14] sm:$0xf]  ;;  %v1106_v2 = vld [vmem:[#allocation2 + $0x38] sm:$0xf] }
  0x4a   : > { %708 = vrot.lane.b32.xlu2 %v625_v18, %s2817_s16  ;;  %v1712_v18 = vld [vmem:[#allocation2 + $0x10] sm:$0xc]  ;;  %v1236_v11 = vshrl.u32 %v1106_v2, 16  ;;  %v1239_v12 = vshll.u32 %v1106_v2, 16 }
  0x4b   : > { %v1735_v28 = vshrl.u32 %v1712_v18, 16  ;;  %v1738_v32 = vshll.u32 %v1712_v18, 16  ;;  %v3098_v35 = vor.u32 %v1221_v19, %v1218_v17  ;;  %v3130_v17 = vld [vmem:[#allocation2 + $0x38] sm:$0xf] }
  0x4d   : > { %v1737_v48 = vrot.slane %v1735_v28, 6  ;;  %v1740_v50 = vrot.slane %v1738_v32, 7  ;;  %v1224_v53 = vrot.slane %v3098_v35, 4  ;;  %v4184_v28 = vrot.slane %v3130_v17, 6 }
  0x4f   : > { %1304 = vrot.lane.b32.xlu1 %v1133_v20, %s2819_s18  ;;  %v1226_v20 = vshrl.u32 %v1105_v4, 16  ;;  %v1741_v62 = vor.u32 %v1740_v50, %v1737_v48  ;;  %v2038_v4 = vrot.slane %v1996_v57, 7  ;;  %v3150_v50 = vld [vmem:[#allocation2 + $0x38] sm:$0xf] }
  0x51   : > { %1023 = vrot.lane.b32.xlu0 %v972_v22, %s2820_s19  ;;  %v1746_v22 = vrot.slane %v1744_v5, 6  ;;  %v1228_v36 = vrot.slane %v1226_v20, 5  ;;  %v3122_v5 = vld [vmem:[#allocation2 + $0x18] sm:$0xf]  ;;  %v1742_v9 = vrot.slane %v1741_v62, 4  ;;  %v2040_v16 = vrot.slane %v2038_v4, 4 }
  0x52   : > { %1021 = vrot.lane.b32.xlu2 %v969_v33, %s2820_s19  ;;  %v3092_v33 = vld [vmem:[#allocation2 + $0x18] sm:$0xf]  ;;  %v2041_v18 = vrot.slane %v3122_v5, 7  ;;  %v3159_v62 = vld [vmem:[#allocation2 + $0x30] sm:$0xf] }
  0x53   : > { %v1750_v39 = vor.u32 %v1749_v24, %v1746_v22  ;;  %v1589_v45 = vrot.slane %v3092_v33, 6  ;;  %v1388_v22 = vld [vmem:[#allocation2 + $0x34] sm:$0xf]  ;;  %v3394_v5 = vld [vmem:[#allocation2 + $0x44] sm:$0xf] }
  0x54   : > { %v2042_v32 = vsel %vm3133_vm4, %v2040_v16, %v2041_v18  ;;  %v4183_v16 = vrot.slane %v3159_v62, 6 }
  0x55   : > { %v1590_v49 = vsel %vm3038_vm12, %v1588_v44, %v1589_v45  ;;  %v1751_v24 = vsel %vm3115_vm15, %v1742_v9, %v1750_v39  ;;  %v626_v44 = vshrl.u32 %v2989_v55, 16 }
  0x57   : > { %1475 = vrot.lane.b32.xlu1 %v1424_v37, %s2821_s20  ;;  %v1231_v37 = vrot.slane %v1229_v21, 6  ;;  %v1723_v21 = vld [vmem:[#allocation2 + $0x3c] sm:$0xf] }
  0x59   : > { %1473 = vrot.lane.b32.xlu0 %v1421_v41, %s2821_s20  ;;  %v1759_v41 = vrot.slane %v1757_v26, 7  ;;  %v3106_v56 = vor.u32 %v1231_v37, %v1228_v36  ;;  %v1238_v26 = vrot.slane %v1236_v11, 5  ;;  %v1844_v36 = vshrl.u32 %v1723_v21, 16  ;;  %v446_v11 = vld [vmem:[#allocation2 + $0x8] sm:$0xf] }
  0x5a   : > { %1306 = vrot.lane.b32.xlu2 %v1143_v58, %s2819_s18  ;;  %v1752_v58 = vrot.slane %v1750_v39, 4  ;;  %v1847_v37 = vshll.u32 %v1723_v21, 16  ;;  %v1837_v39 = vshll.u32 %v1722_v25, 16  ;;  %464 = vst.msk [vmem:[#allocation3 + $0x8] sm:$0xf] %vm407_vm0, %v446_v11  ;;  %v3168_v21 = vrot.slane %v626_v44, 4 }
  0x5b   : > { %v3109_v59 = vor.u32 %v1759_v41, %v1756_v40  ;;  %v1233_v3 = vsel %vm3017_vm9, %v1224_v53, %v3106_v56  ;;  %v1724_v40 = vld [vmem:[#allocation2 + $0x40] sm:$0xf]  ;;  %v1834_v41 = vshrl.u32 %v1722_v25, 16  ;;  %v1234_v53 = vrot.slane %v3106_v56, 4  ;;  %v447_v44 = vld [vmem:[#allocation2 + $0xc] sm:$0xf] }
  0x5c   : > { %v1846_v55 = vrot.slane %v1844_v36, 6  ;;  %v1849_v2 = vrot.slane %v1847_v37, 7  ;;  %v1453_v56 = vrot.slane %v3150_v50, 6  ;;  %v1839_v9 = vrot.slane %v1837_v39, 7  ;;  %v2006_v39 = vld [vmem:[#allocation2 + $0x3c] sm:$0xf] }
  0x5d   : > { %v1761_v6 = vsel %vm3115_vm15, %v1752_v58, %v3109_v59  ;;  %v1615_v58 = vrot.slane %v4184_v28, 4  ;;  %v1449_v37 = vrot.slane %v4183_v16, 4  ;;  %465 = vst.msk [vmem:[#allocation3 + $0xc] sm:$0xf] %vm407_vm0, %v447_v44  ;;  %v3205_v11 = vld [vmem:[#allocation2 + $0x40] sm:$0xf] }
  0x5e   : > { %v1850_v25 = vor.u32 %v1849_v2, %v1846_v55  ;;  %v3193_v55 = vld [vmem:[#allocation2 + $0x40] sm:$0xf]  ;;  %v449_v2 = vld [vmem:[#allocation2 + $0x14] sm:$0xf]  ;;  %v3223_v44 = vld [vmem:[#allocation2 + $0x18] sm:$0xf] }
  0x5f   : > { %1639 = vrot.lane.b32.xlu1 %v1587_v0, %s2822_s21  ;;  %467 = vst.msk [vmem:[#allocation3 + $0x14] sm:$0xf] %vm407_vm0, %v449_v2 }
  0x61   : > { %877 = vrot.lane.b32.xlu0 %v836_v7, %s2818_s17  ;;  %v1995_v7 = vld [vmem:[#allocation2 + $0x10] sm:$0x8] }
  0x62   : > { %875 = vrot.lane.b32.xlu2 %v833_v27, %s2818_s17  ;;  %v2638_v20 = vrot.slane %v1995_v7, 11  ;;  %v1241_v27 = vrot.slane %v1239_v12, 6  ;;  %v1836_v7 = vrot.slane %v1834_v41, 6 }
  0x64   : > { %v2039_v48 = vsel %vm3133_vm4, %v2638_v20, %v2038_v4  ;;  %v3153_v57 = vor.u32 %v1241_v27, %v1238_v26  ;;  %v1857_v4 = vshll.u32 %v1724_v40, 16  ;;  %v444_v20 = vld [vmem:[#allocation2] sm:$0xf]  ;;  %v3181_v36 = vor.u32 %v1839_v9, %v1836_v7 }
  0x65   : > { %462 = vst.msk [vmem:[#allocation3] sm:$0xf] %vm407_vm0, %v444_v20  ;;  %v1619_v9 = vrot.slane %v3193_v55, 6  ;;  %v807_v20 = vrot.slane %v805_v54, 4  ;;  %v452_v54 = vld [vmem:[#allocation2 + $0x20] sm:$0xf] }
  0x66   : > { %v1243_v12 = vsel %vm3017_vm9, %v1234_v53, %v3153_v57  ;;  %v1859_v27 = vrot.slane %v1857_v4, 7  ;;  %v2068_v4 = vrot.slane %v2006_v39, 7  ;;  %470 = vst.msk [vmem:[#allocation3 + $0x20] sm:$0xf] %vm407_vm0, %v452_v54 }
  0x67   : > { %1043 = vrot.lane.b32.xlu1 %v1002_v34, %s2820_s19  ;;  %v3144_v34 = vld [vmem:[#allocation2 + $0x3c] sm:$0xf] }
  0x69   : > { %1041 = vrot.lane.b32.xlu0 %v999_v38, %s2820_s19  ;;  %v1450_v38 = vrot.slane %v1388_v22, 6 }
  0x6a   : > { %1641 = vrot.lane.b32.xlu2 %v1590_v49, %s2822_s21  ;;  %v1616_v49 = vrot.slane %v3144_v34, 6 }
  0x6b   : > { %v1451_v53 = vsel %vm3038_vm12, %v1449_v37, %v1450_v38 }
  0x6c   : > { %v1617_v22 = vsel %vm3038_vm12, %v1615_v58, %v1616_v49  ;;  %v445_v58 = vld [vmem:[#allocation2 + $0x4] sm:$0xf]  ;;  %v1618_v7 = vrot.slane %v1616_v49, 4  ;;  %v2071_v49 = vrot.slane %v3205_v11, 7 }
  0x6d   : > { %463 = vst.msk [vmem:[#allocation3 + $0x4] sm:$0xf] %vm407_vm0, %v445_v58 }
  0x6f   : > { %1324 = vrot.lane.b32.xlu1 %v1233_v3, %s2819_s18  ;;  %v1854_v3 = vshrl.u32 %v1724_v40, 16  ;;  %v1852_v40 = vrot.slane %v1850_v25, 4 }
  0x71   : > { %1924 = vrot.lane.b32.xlu0 %v1761_v6, %s2823_s22  ;;  %v1452_v6 = vrot.slane %v1450_v38, 4  ;;  %v1856_v26 = vrot.slane %v1854_v3, 6 }
  0x72   : > { %1922 = vrot.lane.b32.xlu2 %v1751_v24, %s2823_s22  ;;  %v448_v24 = vld [vmem:[#allocation2 + $0x10] sm:$0xf] }
  0x73   : > { %466 = vst.msk [vmem:[#allocation3 + $0x10] sm:$0xf] %vm407_vm0, %v448_v24  ;;  %v1454_v34 = vsel %vm3038_vm12, %v1452_v6, %v1453_v56  ;;  %v3186_v41 = vor.u32 %v1859_v27, %v1856_v26  ;;  %v762_v6 = vld [vmem:[#allocation2 + $0xc] sm:$0xf]  ;;  %v2070_v24 = vrot.slane %v2068_v4, 4 }
  0x74   : > { %v931_v26 = vld [vmem:[#allocation2 + $0x14] sm:$0xf] }
  0x75   : > { %v1861_v3 = vsel %vm3115_vm15, %v1852_v40, %v3186_v41  ;;  %v1097_v27 = vld [vmem:[#allocation2 + $0x14] sm:$0xf]  ;;  %v974_v39 = vrot.slane %v931_v26, 5  ;;  %v2072_v58 = vsel %vm3133_vm4, %v2070_v24, %v2071_v49  ;;  %v1862_v50 = vrot.slane %v3186_v41, 4 }
  0x76   : > { %v493_v26 = vld [vmem:[#allocation2 + $0x34] sm:$0xf] }
  0x77   : > { %2093 = vrot.lane.b32.xlu1 %v2042_v32, %s2824_s23  ;;  %v629_v32 = vor.u32 %v3168_v21, %v3013_v10 }
  0x79   : > { %2091 = vrot.lane.b32.xlu0 %v2039_v48, %s2824_s23  ;;  %v1842_v48 = vrot.slane %v3181_v36, 4 }
  0x7a   : > { %1326 = vrot.lane.b32.xlu2 %v1243_v12, %s2819_s18  ;;  %v3207_v12 = vld [vmem:[#allocation2 + $0x38] sm:$0xf] }
  0x7b   : > { %v1851_v38 = vsel %vm3115_vm15, %v1842_v48, %v1850_v25  ;;  %v1620_v25 = vsel %vm3038_vm12, %v1618_v7, %v1619_v9  ;;  %v4182_v37 = vrot.slane %v3207_v12, 7  ;;  %v1146_v48 = vshrl.u32 %v1097_v27, 16 }
  0x7c   : > { %v977_v7 = vrot.slane %v3223_v44, 5 }
  0x7d   : > { %v2067_v2 = vrot.slane %v4182_v37, 4  ;;  %v1148_v24 = vrot.slane %v1146_v48, 5  ;;  %v3242_v37 = vld [vmem:[#allocation2 + $0x10] sm:$0xf]  ;;  %v632_v48 = vshll.u32 %v493_v26, 16 }
  0x7f   : > { %1659 = vrot.lane.b32.xlu1 %v1617_v22, %s2822_s21  ;;  %v808_v22 = vrot.slane %v762_v6, 5  ;;  %v1098_v6 = vld [vmem:[#allocation2 + $0x18] sm:$0xf]  ;;  %v2069_v54 = vsel %vm3133_vm4, %v2067_v2, %v2068_v4 }
  0x80   : > { %v1159_v43 = vshll.u32 %v1098_v6, 16 }
  0x81   : > { %1495 = vrot.lane.b32.xlu0 %v1454_v34, %s2821_s20  ;;  %v451_v34 = vld [vmem:[#allocation2 + $0x1c] sm:$0xf]  ;;  %v809_v40 = vsel %vm2996_vm6, %v807_v20, %v808_v22  ;;  %v973_v20 = vrot.slane %v971_v15, 4 }
  0x82   : > { %1493 = vrot.lane.b32.xlu2 %v1451_v53, %s2821_s20  ;;  %469 = vst.msk [vmem:[#allocation3 + $0x1c] sm:$0xf] %vm407_vm0, %v451_v34  ;;  %v1149_v53 = vshll.u32 %v1097_v27, 16  ;;  %v454_v34 = vld [vmem:[#allocation2 + $0x28] sm:$0xf]  ;;  %v1161_v2 = vrot.slane %v1159_v43, 6 }
  0x83   : > { %472 = vst.msk [vmem:[#allocation3 + $0x28] sm:$0xf] %vm407_vm0, %v454_v34  ;;  %v975_v4 = vsel %vm2996_vm6, %v973_v20, %v974_v39  ;;  %v1380_v20 = vld [vmem:[#allocation2 + $0x14] sm:$0xf]  ;;  %v3270_v43 = vld [vmem:[#allocation2 + $0x18] sm:$0xf] }
  0x84   : > { %v1151_v27 = vrot.slane %v1149_v53, 6 }
  0x86   : > { %v1152_v53 = vor.u32 %v1151_v27, %v1148_v24 }
  0x87   : > { %1944 = vrot.lane.b32.xlu1 %v1861_v3, %s2823_s22 }
  0x88   : > { %v1154_v24 = vrot.slane %v1152_v53, 4 }
  0x89   : > { %1942 = vrot.lane.b32.xlu0 %v1851_v38, %s2823_s22  ;;  %v976_v38 = vrot.slane %v974_v39, 4 }
  0x8a   : > { %1661 = vrot.lane.b32.xlu2 %v1620_v25, %s2822_s21  ;;  %v1156_v25 = vshrl.u32 %v1098_v6, 16  ;;  %v811_v6 = vrot.slane %v3242_v37, 5  ;;  %v1099_v37 = vld [vmem:[#allocation2 + $0x1c] sm:$0xf] }
  0x8b   : > { %v978_v15 = vsel %vm2996_vm6, %v976_v38, %v977_v7  ;;  %v630_v38 = vrot.slane %v629_v32, 4 }
  0x8c   : > { %v695_v3 = vpop.permute.xlu2 %694 }
  0x8d   : > { %745 = vst.msk [vmem:[#allocation3 + $0x10] sm:$0xf] %vm740_vm5, %v695_v3  ;;  %v810_v3 = vrot.slane %v808_v22, 4  ;;  %v636_v22 = vshrl.u32 %v493_v26, 16 }
  0x8f   : > { %859 = vrot.lane.b32.xlu1 %v809_v40, %s2818_s17  ;;  %v453_v40 = vld [vmem:[#allocation2 + $0x24] sm:$0xf]  ;;  %v812_v10 = vsel %vm2996_vm6, %v810_v3, %v811_v6  ;;  %v638_v8 = vrot.slane %v636_v22, 4 }
  0x90   : > { %471 = vst.msk [vmem:[#allocation3 + $0x24] sm:$0xf] %vm407_vm0, %v453_v40  ;;  %v634_v40 = vrot.slane %v632_v48, 5  ;;  %v3278_v48 = vld [vmem:[#allocation2 + $0x38] sm:$0xf] }
  0x91   : > { %2113 = vrot.lane.b32.xlu0 %v2072_v58, %s2824_s23  ;;  %v1158_v58 = vrot.slane %v1156_v25, 5  ;;  %v1426_v25 = vrot.slane %v1380_v20, 6  ;;  %v772_v20 = vld [vmem:[#allocation2 + $0x34] sm:$0xf] }
  0x92   : > { %2111 = vrot.lane.b32.xlu2 %v2069_v54, %s2824_s23  ;;  %v635_v32 = vsel %vm2937_vm3, %v630_v38, %v634_v40  ;;  %v1144_v54 = vrot.slane %v3056_v46, 4  ;;  %v1425_v46 = vrot.slane %v1423_v29, 4  ;;  %v642_v38 = vshll.u32 %v3278_v48, 16 }
  0x93   : > { %v3261_v27 = vor.u32 %v1161_v2, %v1158_v58  ;;  %v1429_v58 = vrot.slane %v3270_v43, 6 }
  0x94   : > { %v697_v34 = vpop.permute.xlu2 %696  ;;  %v1153_v3 = vsel %vm3017_vm9, %v1144_v54, %v1152_v53  ;;  %v1427_v29 = vsel %vm3038_vm12, %v1425_v46, %v1426_v25  ;;  %v838_v53 = vrot.slane %v772_v20, 5  ;;  %v941_v54 = vld [vmem:[#allocation2 + $0x3c] sm:$0xf]  ;;  %v3328_v20 = vld [vmem:[#allocation2 + $0x40] sm:$0xf] }
  0x95   : > { %746 = vst.msk [vmem:[#allocation3 + $0x14] sm:$0xf] %vm740_vm5, %v697_v34  ;;  %v1163_v26 = vsel %vm3017_vm9, %v1154_v24, %v3261_v27  ;;  %v639_v34 = vor.u32 %v638_v8, %v634_v40  ;;  %v3296_v24 = vld [vmem:[#allocation2 + $0x1c] sm:$0xf] }
  0x97   : > { %1027 = vrot.lane.b32.xlu1 %v978_v15, %s2820_s19  ;;  %v640_v40 = vrot.slane %v639_v34, 4 }
  0x99   : > { %1025 = vrot.lane.b32.xlu0 %v975_v4, %s2820_s19  ;;  %v691_v39 = vpop.permute.xlu1 %690  ;;  %v1428_v4 = vrot.slane %v1426_v25, 4  ;;  %v1591_v25 = vrot.slane %v1589_v45, 4  ;;  %v1004_v45 = vrot.slane %v941_v54, 5 }
  0x9a   : > { %743 = vst.msk [vmem:[#allocation3 + $0x8] sm:$0xf] %vm740_vm5, %v691_v39  ;;  %861 = vrot.lane.b32.xlu2 %v812_v10, %s2818_s17  ;;  %v3302_v10 = vrot.slane %v642_v38, 5  ;;  %v1107_v38 = vld [vmem:[#allocation2 + $0x3c] sm:$0xf] }
  0x9b   : > { %v687_v21 = vpop.permute.xlu0 %686  ;;  %v1430_v22 = vsel %vm3038_vm12, %v1428_v4, %v1429_v58  ;;  %v840_v4 = vrot.slane %v838_v53, 4 }
  0x9c   : > { %741 = vst.msk [vmem:[#allocation3] sm:$0xf] %vm740_vm5, %v687_v21  ;;  %v703_v15 = vpop.permute.xlu2 %702  ;;  %v3310_v21 = vld [vmem:[#allocation2 + $0x38] sm:$0xf]  ;;  %v645_v46 = vsel %vm2937_vm3, %v640_v40, %v3302_v10 }
  0x9d   : > { %749 = vst.msk [vmem:[#allocation3 + $0x20] sm:$0xf] %vm740_vm5, %v703_v15  ;;  %v426_v15 = vld [vmem:[%s3307_s14] sm:$0xf] }
  0x9e   : > { %435 = vst.msk [vmem:[#allocation2 + $0x48] sm:$0xf] %vm407_vm0, %v426_v15  ;;  %v1007_v15 = vrot.slane %v3328_v20, 5 }
  0x9f   : > { %710 = vrot.lane.b32.xlu1 %v635_v32, %s2817_s16 }
  0xa1   : > { %1310 = vrot.lane.b32.xlu0 %v1163_v26, %s2819_s18  ;;  %v693_v2 = vpop.permute.xlu1 %692  ;;  %v1592_v26 = vrot.slane %v3296_v24, 6 }
  0xa2   : > { %744 = vst.msk [vmem:[#allocation3 + $0xc] sm:$0xf] %vm740_vm5, %v693_v2  ;;  %1308 = vrot.lane.b32.xlu2 %v1153_v3, %s2819_s18  ;;  %v841_v2 = vrot.slane %v3310_v21, 5  ;;  %v1715_v3 = vld [vmem:[#allocation2 + $0x1c] sm:$0xf] }
  0xa3   : > { %v689_v39 = vpop.permute.xlu0 %688  ;;  %v1593_v34 = vsel %vm3038_vm12, %v1591_v25, %v1592_v26  ;;  %v1764_v24 = vshrl.u32 %v1715_v3, 16  ;;  %v1767_v23 = vshll.u32 %v1715_v3, 16  ;;  %v1249_v25 = vshll.u32 %v1107_v38, 16 }
  0xa4   : > { %742 = vst.msk [vmem:[#allocation3 + $0x4] sm:$0xf] %vm740_vm5, %v689_v39  ;;  %v709_v32 = vpop.permute.xlu2 %708  ;;  %v1716_v39 = vld [vmem:[#allocation2 + $0x20] sm:$0xf] }
  0xa5   : > { %752 = vst.msk [vmem:[#allocation3 + $0x2c] sm:$0xf] %vm740_vm5, %v709_v32  ;;  %v1246_v32 = vshrl.u32 %v1107_v38, 16  ;;  %v1774_v54 = vshrl.u32 %v1716_v39, 16  ;;  %v1769_v42 = vrot.slane %v1767_v23, 7  ;;  %v1251_v16 = vrot.slane %v1249_v25, 6 }
  0xa7   : > { %1479 = vrot.lane.b32.xlu1 %v1430_v22, %s2821_s20  ;;  %v842_v22 = vsel %vm2996_vm6, %v840_v4, %v841_v2  ;;  %v1003_v4 = vrot.slane %v1001_v14, 4  ;;  %v1248_v38 = vrot.slane %v1246_v32, 5  ;;  %v1776_v28 = vrot.slane %v1774_v54, 6  ;;  %v1998_v54 = vld [vmem:[#allocation2 + $0x1c] sm:$0xf] }
  0xa9   : > { %1477 = vrot.lane.b32.xlu0 %v1427_v29, %s2821_s20  ;;  %v701_v8 = vpop.permute.xlu1 %700  ;;  %v837_v29 = vrot.slane %v835_v52, 4  ;;  %v1777_v52 = vshll.u32 %v1716_v39, 16  ;;  %v1005_v14 = vsel %vm2996_vm6, %v1003_v4, %v1004_v45  ;;  %v3358_v32 = vor.u32 %v1251_v16, %v1248_v38  ;;  %v1108_v4 = vld [vmem:[#allocation2 + $0x40] sm:$0xf] }
  0xaa   : > { %748 = vst.msk [vmem:[#allocation3 + $0x1c] sm:$0xf] %vm740_vm5, %v701_v8  ;;  %712 = vrot.lane.b32.xlu2 %v645_v46, %s2817_s16  ;;  %v1006_v8 = vrot.slane %v1004_v45, 4  ;;  %v2044_v16 = vrot.slane %v1998_v54, 7  ;;  %v1390_v54 = vld [vmem:[#allocation2 + $0x3c] sm:$0xf] }
  0xab   : > { %v699_v33 = vpop.permute.xlu0 %698  ;;  %v839_v3 = vsel %vm2996_vm6, %v837_v29, %v838_v53  ;;  %v1779_v53 = vrot.slane %v1777_v52, 7  ;;  %v1244_v29 = vrot.slane %v3153_v57, 4  ;;  %v1256_v52 = vshrl.u32 %v1108_v4, 16 }
  0xac   : > { %747 = vst.msk [vmem:[#allocation3 + $0x18] sm:$0xf] %vm740_vm5, %v699_v33  ;;  %v1022_v40 = vpop.permute.xlu2 %1021  ;;  %v1766_v33 = vrot.slane %v1764_v24, 6  ;;  %v1008_v1 = vsel %vm2996_vm6, %v1006_v8, %v1007_v15  ;;  %v1595_v24 = vrot.slane %v3345_v61, 6  ;;  %v2046_v38 = vrot.slane %v2044_v16, 4 }
  0xad   : > { %v3362_v8 = vor.u32 %v1779_v53, %v1776_v28  ;;  %v1253_v57 = vsel %vm3017_vm9, %v1244_v29, %v3358_v32  ;;  %v2043_v53 = vrot.slane %v2041_v18, 4  ;;  %v1717_v61 = vld [vmem:[#allocation2 + $0x24] sm:$0xf] }
  0xae   : > { %v1770_v39 = vor.u32 %v1769_v42, %v1766_v33  ;;  %v3373_v33 = vld [vmem:[#allocation2 + $0x20] sm:$0xf]  ;;  %v1762_v42 = vrot.slane %v3109_v59, 4 }
  0xaf   : > { %1643 = vrot.lane.b32.xlu1 %v1593_v34, %s2822_s21 }
  0xb0   : > { %v1772_v45 = vrot.slane %v1770_v39, 4  ;;  %v1771_v59 = vsel %vm3115_vm15, %v1762_v42, %v1770_v39  ;;  %v2045_v39 = vsel %vm3133_vm4, %v2043_v53, %v2044_v16  ;;  %v1622_v16 = vrot.slane %v3394_v5, 6 }
  0xb1   : > { %881 = vrot.lane.b32.xlu0 %v842_v22, %s2818_s17  ;;  %v707_v46 = vpop.permute.xlu1 %706  ;;  %v1594_v22 = vrot.slane %v1592_v26, 4 }
  0xb2   : > { %751 = vst.msk [vmem:[#allocation3 + $0x28] sm:$0xf] %vm740_vm5, %v707_v46  ;;  %879 = vrot.lane.b32.xlu2 %v839_v3, %s2818_s17  ;;  %v1781_v28 = vsel %vm3115_vm15, %v1772_v45, %v3362_v8  ;;  %v1259_v3 = vshll.u32 %v1108_v4, 16  ;;  %v2186_v4 = vld [vmem:[%s4176_s2 + $0x10] sm:$0x3] }
  0xb3   : > { %v705_v34 = vpop.permute.xlu0 %704  ;;  %v1596_v26 = vsel %vm3038_vm12, %v1594_v22, %v1595_v24  ;;  %v1258_v22 = vrot.slane %v1256_v52, 5  ;;  %v2241_v52 = vunpack.c.l.b16 %v2186_v4 }
  0xb4   : > { %750 = vst.msk [vmem:[#allocation3 + $0x24] sm:$0xf] %vm740_vm5, %v705_v34  ;;  %v1307_v23 = vpop.permute.xlu2 %1306  ;;  %v1261_v29 = vrot.slane %v1259_v3, 6  ;;  %v3410_v3 = vld [vmem:[#allocation2 + $0x40] sm:$0xf] }
  0xb5   : > { %v1459_v55 = vrot.slane %v3410_v3, 6 }
  0xb6   : > { %v3404_v42 = vor.u32 %v1261_v29, %v1258_v22 }
  0xb7   : > { %1047 = vrot.lane.b32.xlu1 %v1008_v1, %s2820_s19  ;;  %v2047_v1 = vrot.slane %v3373_v33, 7 }
  0xb9   : > { %1045 = vrot.lane.b32.xlu0 %v1005_v14, %s2820_s19  ;;  %v858_v25 = vpop.permute.xlu1 %857 }
  0xba   : > { %911 = vst.msk [vmem:[#allocation3 + $0x4] sm:$0xf] %vm909_vm7, %v858_v25  ;;  %1645 = vrot.lane.b32.xlu2 %v1596_v26, %s2822_s21  ;;  %v2048_v26 = vsel %vm3133_vm4, %v2046_v38, %v2047_v1 }
  0xbb   : > { %v856_v46 = vpop.permute.xlu0 %855 }
  0xbc   : > { %910 = vst.msk [vmem:[#allocation3] sm:$0xf] %vm909_vm7, %v856_v46  ;;  %v876_v34 = vpop.permute.xlu2 %875  ;;  %v1726_v46 = vld [vmem:[#allocation2 + $0x48] sm:$0xf] }
  0xbd   : > { %1076 = vst.msk [vmem:[#allocation3] sm:$0xf] %vm1075_vm8, %v1022_v40  ;;  %v1725_v40 = vld [vmem:[#allocation2 + $0x44] sm:$0xf]  ;;  %v1877_v53 = vshll.u32 %v1726_v46, 16 }
  0xbe   : > { %920 = vst.msk [vmem:[#allocation3 + $0x28] sm:$0xf] %vm909_vm7, %v876_v34  ;;  %v1864_v45 = vshrl.u32 %v1725_v40, 16  ;;  %v1867_v18 = vshll.u32 %v1725_v40, 16 }
  0xbf   : > { %1328 = vrot.lane.b32.xlu1 %v1253_v57, %s2819_s18  ;;  %v1456_v57 = vrot.slane %v1390_v54, 6  ;;  %v1879_v5 = vrot.slane %v1877_v53, 7 }
  0xc0   : > { %v1866_v38 = vrot.slane %v1864_v45, 6  ;;  %v1869_v40 = vrot.slane %v1867_v18, 7  ;;  %v2719_v18 = vld [vmem:[%s4176_s2 + $0x8] sm:$0xff] }
  0xc1   : > { %1928 = vrot.lane.b32.xlu0 %v1781_v28, %s2823_s22  ;;  %v1305_v14 = vpop.permute.xlu1 %1304  ;;  %v1254_v28 = vrot.slane %v3358_v32, 4  ;;  %v1458_v22 = vrot.slane %v1456_v57, 4 }
  0xc2   : > { %1359 = vst.msk [vmem:[#allocation3] sm:$0xf] %vm1358_vm11, %v1305_v14  ;;  %1926 = vrot.lane.b32.xlu2 %v1771_v59, %s2823_s22  ;;  %v1874_v14 = vshrl.u32 %v1726_v46, 16  ;;  %v2244_v59 = vpack.c.b16 %v2241_v52, %v2241_v52  ;;  %v1870_v45 = vor.u32 %v1869_v40, %v1866_v38  ;;  %v1455_v46 = vrot.slane %v1453_v56, 4  ;;  %v2008_v40 = vld [vmem:[#allocation2 + $0x44] sm:$0xf] }
  0xc3   : > { %v1024_v25 = vpop.permute.xlu0 %1023 }
  0xc4   : > { %1077 = vst.msk [vmem:[#allocation3 + $0x4] sm:$0xf] %vm1075_vm8, %v1024_v25  ;;  %v1642_v34 = vpop.permute.xlu2 %1641  ;;  %v2277_v29 = vsel %vm1415_vm10, %v2244_v59, 0  ;;  %vm1976_vm10 = vcmask 257248   ;;  %v1457_v56 = vsel %vm3038_vm12, %v1455_v46, %v1456_v57  ;;  %v764_v59 = vld [vmem:[#allocation2 + $0x14] sm:$0xf]  ;;  %v1871_v41 = vsel %vm3115_vm15, %v1862_v50, %v1870_v45 }
  0xc5   : > { %1360 = vst.msk [vmem:[#allocation3 + $0x4] sm:$0xf] %vm1358_vm11, %v1307_v23  ;;  %v1621_v23 = vrot.slane %v1619_v9, 4  ;;  %v1263_v9 = vsel %vm3017_vm9, %v1254_v28, %v3404_v42  ;;  %2284 = vmatpush.bf16.msra.mxu0 %v2277_v29  ;;  %2720 = vmatpush.bf16.msra.mxu2 %v2277_v29  ;;  %v1872_v28 = vrot.slane %v1870_v45, 4  ;;  %v2074_v57 = vrot.slane %v2008_v40, 7 }
  0xc6   : > { %v1166_v50 = vshrl.u32 %v1099_v37, 16 }
  0xc7   : > { %2097 = vrot.lane.b32.xlu1 %v2048_v26, %s2824_s23  ;;  %v1623_v54 = vsel %vm3038_vm12, %v1621_v23, %v1622_v16  ;;  %v1876_v26 = vrot.slane %v1874_v14, 6  ;;  %v2718_v23 = vld [vmem:[%s4176_s2] sm:$0xff]  ;;  %v3445_v14 = vld [vmem:[#allocation2 + $0x48] sm:$0xf]  ;;  %v2076_v45 = vrot.slane %v2074_v57, 4 }
  0xc9   : > { %2095 = vrot.lane.b32.xlu0 %v2045_v39, %s2824_s23  ;;  %v1476_v32 = vpop.permute.xlu1 %1475  ;;  %v1460_v39 = vsel %vm3038_vm12, %v1458_v22, %v1459_v55  ;;  %2285 = vmatpush.bf16.msra.mxu0 %v2719_v18  ;;  %v3434_v52 = vor.u32 %v1879_v5, %v1876_v26  ;;  %v1625_v22 = vrot.slane %v3445_v14, 6  ;;  %v933_v5 = vld [vmem:[#allocation2 + $0x1c] sm:$0xf] }
  0xca   : > { %1529 = vst.msk [vmem:[#allocation3 + $0x4] sm:$0xf] %vm1527_vm13, %v1476_v32  ;;  %1330 = vrot.lane.b32.xlu2 %v1263_v9, %s2819_s18  ;;  %2721 = vmatpush.bf16.msra.mxu2 %v2719_v18  ;;  %v1624_v32 = vrot.slane %v1622_v16, 4  ;;  %v3456_v9 = vld [vmem:[#allocation2 + $0x48] sm:$0xf] }
  0xcb   : > { %v1474_v25 = vpop.permute.xlu0 %1473  ;;  %1695 = vst.msk [vmem:[#allocation3 + $0x4] sm:$0xf] %vm1693_vm14, %v1642_v34  ;;  %v1881_v53 = vsel %vm3115_vm15, %v1872_v28, %v3434_v52  ;;  %v2077_v16 = vrot.slane %v3456_v9, 7  ;;  %v3472_v28 = vld [vmem:[#allocation2 + $0x20] sm:$0xf] }
  0xcc   : > { %1528 = vst.msk [vmem:[#allocation3] sm:$0xf] %vm1527_vm13, %v1474_v25  ;;  %v1923_v4 = vpop.permute.xlu2 %1922  ;;  %v813_v25 = vrot.slane %v811_v6, 4  ;;  %v1626_v18 = vsel %vm3038_vm12, %v1624_v32, %v1625_v22  ;;  %v646_v6 = vshrl.u32 %v3278_v48, 16  ;;  %v2073_v48 = vrot.slane %v2071_v49, 4 }
  0xcd   : > { %2286 = vmatpush.bf16.msra.mxu0 %v2718_v23  ;;  %v979_v32 = vrot.slane %v977_v7, 4 }
  0xce   : > { %2722 = vmatpush.bf16.msra.mxu2 %v2718_v23  ;;  %v2078_v23 = vsel %vm3133_vm4, %v2076_v45, %v2077_v16 }
  0xcf   : > { %1663 = vrot.lane.b32.xlu1 %v1623_v54, %s2822_s21  ;;  %v814_v54 = vrot.slane %v764_v59, 5  ;;  %v648_v59 = vrot.slane %v646_v6, 4 }
  0xd1   : > { %1499 = vrot.lane.b32.xlu0 %v1460_v39, %s2821_s20  ;;  %v1640_v34 = vpop.permute.xlu1 %1639  ;;  %v815_v46 = vsel %vm2996_vm6, %v813_v25, %v814_v54  ;;  %v649_v7 = vor.u32 %v648_v59, %v3302_v10 }
  0xd2   : > { %1694 = vst.msk [vmem:[#allocation3] sm:$0xf] %vm1693_vm14, %v1640_v34  ;;  %1497 = vrot.lane.b32.xlu2 %v1457_v56, %s2821_s20  ;;  %v1100_v34 = vld [vmem:[#allocation2 + $0x20] sm:$0xf]  ;;  %v1169_v56 = vshll.u32 %v1099_v37, 16 }
  0xd3   : > { %v878_v38 = vpop.permute.xlu0 %877  ;;  %1977 = vst.msk [vmem:[#allocation3] sm:$0xf] %vm1976_vm10, %v1923_v4  ;;  %v980_v4 = vrot.slane %v933_v5, 5  ;;  %v1176_v25 = vshrl.u32 %v1100_v34, 16  ;;  %v1179_v49 = vshll.u32 %v1100_v34, 16  ;;  %v2075_v5 = vsel %vm3133_vm4, %v2073_v48, %v2074_v57 }
  0xd4   : > { %921 = vst.msk [vmem:[#allocation3 + $0x2c] sm:$0xf] %vm909_vm7, %v878_v38  ;;  %v1327_v29 = vpop.permute.xlu2 %1326  ;;  %v1171_v11 = vrot.slane %v1169_v56, 6  ;;  %v650_v56 = vrot.slane %v649_v7, 4 }
  0xd5   : > { %v982_v40 = vrot.slane %v980_v4, 4  ;;  %v981_v37 = vsel %vm2996_vm6, %v979_v32, %v980_v4  ;;  %v1178_v6 = vrot.slane %v1176_v25, 5 }
  0xd7   : > { %1948 = vrot.lane.b32.xlu1 %v1881_v53, %s2823_s22  ;;  %v983_v53 = vrot.slane %v3472_v28, 5 }
  0xd9   : > { %1946 = vrot.lane.b32.xlu0 %v1871_v41, %s2823_s22  ;;  %v1044_v26 = vpop.permute.xlu1 %1043  ;;  %v984_v44 = vsel %vm2996_vm6, %v982_v40, %v983_v53 }
  0xda   : > { %1087 = vst.msk [vmem:[#allocation3 + $0x2c] sm:$0xf] %vm1075_vm8, %v1044_v26  ;;  %1665 = vrot.lane.b32.xlu2 %v1626_v18, %s2822_s21  ;;  %v1168_v26 = vrot.slane %v1166_v50, 5  ;;  %v3490_v18 = vld [vmem:[#allocation2 + $0x18] sm:$0xf] }
  0xdb   : > { %v1042_v39 = vpop.permute.xlu0 %1041  ;;  %1370 = vst.msk [vmem:[#allocation3 + $0x2c] sm:$0xf] %vm1358_vm11, %v1327_v29  ;;  %v495_v29 = vld [vmem:[#allocation2 + $0x3c] sm:$0xf]  ;;  %v817_v34 = vrot.slane %v3490_v18, 5 }
  0xdc   : > { %1086 = vst.msk [vmem:[#allocation3 + $0x28] sm:$0xf] %vm1075_vm8, %v1042_v39  ;;  %v1494_v38 = vpop.permute.xlu2 %1493  ;;  %v652_v39 = vshll.u32 %v495_v29, 16  ;;  %v1172_v57 = vor.u32 %v1171_v11, %v1168_v26  ;;  %v656_v4 = vshrl.u32 %v495_v29, 16  ;;  %v3514_v26 = vld [vmem:[#allocation2 + $0x20] sm:$0xf] }
  0xdd   : > { %v1164_v11 = vrot.slane %v3261_v27, 4  ;;  %v1435_v7 = vrot.slane %v3514_v26, 6  ;;  %v1431_v27 = vrot.slane %v1429_v58, 4  ;;  %v3542_v58 = vld [vmem:[#allocation2 + $0x24] sm:$0xf] }
  0xde   : > { %v654_v48 = vrot.slane %v652_v39, 5  ;;  %v1174_v40 = vrot.slane %v1172_v57, 4 }
  0xdf   : > { %863 = vrot.lane.b32.xlu1 %v815_v46, %s2818_s17  ;;  %v1181_v46 = vrot.slane %v1179_v49, 6  ;;  %v658_v49 = vrot.slane %v656_v4, 4  ;;  %v457_v4 = vld [vmem:[#allocation2 + $0x34] sm:$0xf] }
  0xe0   : > { %v655_v32 = vsel %vm2937_vm3, %v650_v56, %v654_v48  ;;  %475 = vst.msk [vmem:[#allocation3 + $0x34] sm:$0xf] %vm407_vm0, %v457_v4 }
  0xe1   : > { %2117 = vrot.lane.b32.xlu0 %v2078_v23, %s2824_s23  ;;  %v1325_v41 = vpop.permute.xlu1 %1324  ;;  %v816_v23 = vrot.slane %v814_v54, 4  ;;  %v3505_v59 = vor.u32 %v1181_v46, %v1178_v6  ;;  %v3529_v6 = vld [vmem:[#allocation2 + $0x3c] sm:$0xf]  ;;  %v1173_v46 = vsel %vm3017_vm9, %v1164_v11, %v1172_v57  ;;  %v427_v57 = vld [vmem:[%s3307_s14 + $0x4] sm:$0xf]  ;;  %v1598_v11 = vrot.slane %v3542_v58, 6 }
  0xe2   : > { %1369 = vst.msk [vmem:[#allocation3 + $0x28] sm:$0xf] %vm1358_vm11, %v1325_v41  ;;  %2115 = vrot.lane.b32.xlu2 %v2075_v5, %s2824_s23 }
  0xe3   : > { %v1925_v45 = vpop.permute.xlu0 %1924  ;;  %1538 = vst.msk [vmem:[#allocation3 + $0x28] sm:$0xf] %vm1527_vm13, %v1494_v38  ;;  %v1382_v38 = vld [vmem:[#allocation2 + $0x1c] sm:$0xf]  ;;  %v818_v54 = vsel %vm2996_vm6, %v816_v23, %v817_v34  ;;  %v1183_v29 = vsel %vm3017_vm9, %v1174_v40, %v3505_v59  ;;  %v659_v23 = vor.u32 %v658_v49, %v654_v48  ;;  %v844_v40 = vrot.slane %v3529_v6, 5 }
  0xe4   : > { %1978 = vst.msk [vmem:[#allocation3 + $0x4] sm:$0xf] %vm1976_vm10, %v1925_v45  ;;  %v1662_v50 = vpop.permute.xlu2 %1661  ;;  %v1432_v25 = vrot.slane %v1382_v38, 6  ;;  %v3522_v45 = vld [vmem:[#allocation2 + $0x40] sm:$0xf] }
  0xe5   : > { %v662_v56 = vshll.u32 %v3522_v45, 16  ;;  %436 = vst.msk [vmem:[#allocation2 + $0x4c] sm:$0xf] %vm407_vm0, %v427_v57  ;;  %v943_v49 = vld [vmem:[#allocation2 + $0x44] sm:$0xf]  ;;  %v666_v18 = vshrl.u32 %v3522_v45, 16 }
  0xe6   : > { %v1433_v48 = vsel %vm3038_vm12, %v1431_v27, %v1432_v25  ;;  %v1718_v57 = vld [vmem:[#allocation2 + $0x28] sm:$0xf]  ;;  %v2079_v45 = vrot.slane %v2077_v16, 4 }
  0xe7   : > { %1031 = vrot.lane.b32.xlu1 %v984_v44, %s2820_s19  ;;  %v1434_v44 = vrot.slane %v1432_v25, 4  ;;  %v1794_v21 = vshrl.u32 %v1718_v57, 16 }
  0xe9   : > { %1029 = vrot.lane.b32.xlu0 %v981_v37, %s2820_s19  ;;  %v2094_v10 = vpop.permute.xlu1 %2093  ;;  %v456_v37 = vld [vmem:[#allocation2 + $0x30] sm:$0xf]  ;;  %v1436_v43 = vsel %vm3038_vm12, %v1434_v44, %v1435_v7  ;;  %v428_v44 = vld [vmem:[%s3307_s14 + $0x8] sm:$0xf] }
  0xea   : > { %2147 = vst.msk [vmem:[#allocation3 + $0x4] sm:$0xf] %vm2145_vm1, %v2094_v10  ;;  %865 = vrot.lane.b32.xlu2 %v818_v54, %s2818_s17  ;;  %v660_v54 = vrot.slane %v659_v23, 4  ;;  %v1010_v23 = vrot.slane %v943_v49, 5 }
  0xeb   : > { %v2092_v41 = vpop.permute.xlu0 %2091  ;;  %474 = vst.msk [vmem:[#allocation3 + $0x30] sm:$0xf] %vm407_vm0, %v456_v37 }
  0xec   : > { %2146 = vst.msk [vmem:[#allocation3] sm:$0xf] %vm2145_vm1, %v2092_v41  ;;  %v2112_v5 = vpop.permute.xlu2 %2111  ;;  %v3549_v41 = vrot.slane %v662_v56, 5  ;;  %v1109_v56 = vld [vmem:[#allocation2 + $0x44] sm:$0xf] }
  0xed   : > { %437 = vst.msk [vmem:[#allocation2 + $0x50] sm:$0xf] %vm407_vm0, %v428_v44  ;;  %v2010_v3 = vld [vmem:[#allocation2 + $0x4c] sm:$0xf] }
  0xee   : > { %v665_v27 = vsel %vm2937_vm3, %v660_v54, %v3549_v41  ;;  %v1266_v54 = vshrl.u32 %v1109_v56, 16 }
  0xef   : > { %714 = vrot.lane.b32.xlu1 %v655_v32, %s2817_s16 }
  0xf1   : > { %1314 = vrot.lane.b32.xlu0 %v1183_v29, %s2819_s18  ;;  %v1660_v39 = vpop.permute.xlu1 %1659  ;;  %v1597_v29 = vrot.slane %v1595_v24, 4 }
  0xf2   : > { %1704 = vst.msk [vmem:[#allocation3 + $0x28] sm:$0xf] %vm1693_vm14, %v1660_v39  ;;  %1312 = vrot.lane.b32.xlu2 %v1173_v46, %s2819_s18  ;;  %v846_v39 = vrot.slane %v844_v40, 4  ;;  %v3571_v46 = vld [vmem:[#allocation2 + $0x48] sm:$0xf] }
  0xf3   : > { %v1496_v10 = vpop.permute.xlu0 %1495  ;;  %v2709_v38 = vld [vmem:[#allocation3] sm:$0xff]  ;;  %v1599_v6 = vsel %vm3038_vm12, %v1597_v29, %v1598_v11 }
  0xf4   : > { %1539 = vst.msk [vmem:[#allocation3 + $0x2c] sm:$0xf] %vm1527_vm13, %v1496_v10  ;;  %2683 = vmatmul.msk.bf16.vlgmr.msra.gmra.mxu0 %vm2247_vm2, %v2709_v38  ;;  %v862_v32 = vpop.permute.xlu2 %861  ;;  %v1784_v10 = vshrl.u32 %v1717_v61, 16  ;;  %v1787_v38 = vshll.u32 %v1717_v61, 16  ;;  %v3589_v61 = vld [vmem:[#allocation2 + $0x28] sm:$0xf] }
  0xf5   : > { %1705 = vst.msk [vmem:[#allocation3 + $0x2c] sm:$0xf] %vm1693_vm14, %v1662_v50  ;;  %v3553_v50 = vld [vmem:[#allocation2 + $0x40] sm:$0xf] }
  0xf6   : > { %913 = vst.msk [vmem:[#allocation3 + $0xc] sm:$0xf] %vm909_vm7, %v862_v32  ;;  %v847_v37 = vrot.slane %v3553_v50, 5  ;;  %v1269_v32 = vshll.u32 %v1109_v56, 16  ;;  %v1786_v49 = vrot.slane %v1784_v10, 6  ;;  %v1789_v44 = vrot.slane %v1787_v38, 7 }
  0xf7   : > { %1483 = vrot.lane.b32.xlu1 %v1436_v43, %s2821_s20  ;;  %v843_v43 = vrot.slane %v841_v2, 4  ;;  %v1797_v2 = vshll.u32 %v1718_v57, 16  ;;  %v1796_v10 = vrot.slane %v1794_v21, 6  ;;  %v1600_v38 = vrot.slane %v1598_v11, 4 }
  0xf8   : > { %v848_v4 = vsel %vm2996_vm6, %v846_v39, %v847_v37  ;;  %v1790_v56 = vor.u32 %v1789_v44, %v1786_v49  ;;  %v1264_v57 = vrot.slane %v3404_v42, 4  ;;  %v1110_v49 = vld [vmem:[#allocation2 + $0x48] sm:$0xf] }
  0xf9   : > { %1481 = vrot.lane.b32.xlu0 %v1433_v48, %s2821_s20  ;;  %v1945_v25 = vpop.permute.xlu1 %1944  ;;  %v1012_v48 = vrot.slane %v1010_v23, 4  ;;  %v845_v39 = vsel %vm2996_vm6, %v843_v43, %v844_v40  ;;  %v1799_v40 = vrot.slane %v1797_v2, 7  ;;  %v3619_v2 = vld [vmem:[#allocation2 + $0x28] sm:$0xf] }
  0xfa   : > { %1988 = vst.msk [vmem:[#allocation3 + $0x2c] sm:$0xf] %vm1976_vm10, %v1945_v25  ;;  %716 = vrot.lane.b32.xlu2 %v665_v27, %s2817_s16  ;;  %v1009_v25 = vrot.slane %v1007_v15, 4  ;;  %v1268_v15 = vrot.slane %v1266_v54, 5  ;;  %v1792_v54 = vrot.slane %v1790_v56, 4 }
  0xfb   : > { %v1943_v24 = vpop.permute.xlu0 %1942 }
  0xfc   : > { %1987 = vst.msk [vmem:[#allocation3 + $0x28] sm:$0xf] %vm1976_vm10, %v1943_v24  ;;  %v1309_v58 = vpop.permute.xlu2 %1308  ;;  %v1271_v24 = vrot.slane %v1269_v32, 6  ;;  %v3607_v32 = vor.u32 %v1799_v40, %v1796_v10  ;;  %v1727_v40 = vld [vmem:[#allocation2 + $0x4c] sm:$0xf] }
  0xfd   : > { %2156 = vst.msk [vmem:[#allocation3 + $0x28] sm:$0xf] %vm2145_vm1, %v2112_v5  ;;  %v1013_v5 = vrot.slane %v3571_v46, 5  ;;  %v1887_v33 = vshll.u32 %v1727_v40, 16 }
  0xff   : > { %1647 = vrot.lane.b32.xlu1 %v1599_v6, %s2822_s21  ;;  %v1014_v20 = vsel %vm2996_vm6, %v1012_v48, %v1013_v5  ;;  %v1011_v6 = vsel %vm2996_vm6, %v1009_v25, %v1010_v23  ;;  %v2000_v48 = vld [vmem:[#allocation2 + $0x24] sm:$0xf]  ;;  %v1015_v50 = vrot.slane %v1013_v5, 4 }
 0x100   : > { %v2050_v21 = vrot.slane %v2000_v48, 7  ;;  %v1392_v48 = vld [vmem:[#allocation2 + $0x44] sm:$0xf] }
 0x101   : > { %885 = vrot.lane.b32.xlu0 %v848_v4, %s2818_s17  ;;  %v860_v29 = vpop.permute.xlu1 %859  ;;  %v1601_v4 = vrot.slane %v3589_v61, 6  ;;  %v430_v61 = vld [vmem:[%s3307_s14 + $0x10] sm:$0xf] }
 0x102   : > { %912 = vst.msk [vmem:[#allocation3 + $0x8] sm:$0xf] %vm909_vm7, %v860_v29  ;;  %883 = vrot.lane.b32.xlu2 %v845_v39, %s2818_s17  ;;  %v3602_v29 = vor.u32 %v1271_v24, %v1268_v15  ;;  %v1801_v39 = vsel %vm3115_vm15, %v1792_v54, %v3607_v32  ;;  %v1279_v15 = vshll.u32 %v1110_v49, 16 }
 0x103   : > { %v2114_v27 = vpop.permute.xlu0 %2113  ;;  %v1602_v11 = vsel %vm3038_vm12, %v1600_v38, %v1601_v4  ;;  %v2049_v38 = vrot.slane %v2047_v1, 4  ;;  %v1728_v1 = vld [vmem:[#allocation2 + $0x50] sm:$0xf]  ;;  %439 = vst.msk [vmem:[#allocation2 + $0x58] sm:$0xf] %vm407_vm0, %v430_v61 }
 0x104   : > { %2157 = vst.msk [vmem:[#allocation3 + $0x2c] sm:$0xf] %vm2145_vm1, %v2114_v27  ;;  %v713_v43 = vpop.permute.xlu2 %712  ;;  %v1273_v44 = vsel %vm3017_vm9, %v1264_v57, %v3602_v29  ;;  %v1782_v27 = vrot.slane %v3362_v8, 4  ;;  %v1281_v57 = vrot.slane %v1279_v15, 6 }
 0x105   : > { %754 = vst.msk [vmem:[#allocation3 + $0x34] sm:$0xf] %vm740_vm5, %v713_v43 }
 0x106   : > { %v1791_v8 = vsel %vm3115_vm15, %v1782_v27, %v1790_v56  ;;  %v2051_v56 = vsel %vm3133_vm4, %v2049_v38, %v2050_v21 }
 0x107   : > { %1051 = vrot.lane.b32.xlu1 %v1014_v20, %s2820_s19  ;;  %v1276_v20 = vshrl.u32 %v1110_v49, 16  ;;  %v1274_v49 = vrot.slane %v3602_v29, 4 }
 0x109   : > { %1049 = vrot.lane.b32.xlu0 %v1011_v6, %s2820_s19  ;;  %v1028_v23 = vpop.permute.xlu1 %1027  ;;  %v2052_v6 = vrot.slane %v2050_v21, 4  ;;  %v1278_v43 = vrot.slane %v1276_v20, 5  ;;  %v3649_v20 = vld [vmem:[#allocation2 + $0x48] sm:$0xf] }
 0x10a   : > { %1079 = vst.msk [vmem:[#allocation3 + $0xc] sm:$0xf] %vm1075_vm8, %v1028_v23  ;;  %1649 = vrot.lane.b32.xlu2 %v1602_v11, %s2822_s21  ;;  %v1561_v11 = vld [vmem:[#allocation2 + $0x4c] sm:$0xf]  ;;  %v1465_v38 = vrot.slane %v3649_v20, 6 }
 0x10b   : > { %v1026_v25 = vpop.permute.xlu0 %1025  ;;  %v2714_v42 = vld [vmem:[#allocation3 + $0x28] sm:$0xff]  ;;  %v1628_v27 = vrot.slane %v1561_v11, 6 }
 0x10c   : > { %1078 = vst.msk [vmem:[#allocation3 + $0x8] sm:$0xf] %vm1075_vm8, %v1026_v25  ;;  %2688 = vmatmul.msk.bf16.vlgmr.msra.gmra.mxu2 %vm2247_vm2, %v2714_v42  ;;  %v880_v24 = vpop.permute.xlu2 %879  ;;  %v1884_v25 = vshrl.u32 %v1727_v40, 16  ;;  %v1462_v42 = vrot.slane %v1392_v48, 6  ;;  %v1897_v40 = vshll.u32 %v1728_v1, 16 }
 0x10d   : > { %1361 = vst.msk [vmem:[#allocation3 + $0x8] sm:$0xf] %vm1358_vm11, %v1309_v58  ;;  %v2053_v58 = vrot.slane %v3619_v2, 7 }
 0x10e   : > { %v1464_v29 = vrot.slane %v1462_v42, 4 }
 0x10f   : > { %1332 = vrot.lane.b32.xlu1 %v1273_v44, %s2819_s18  ;;  %v2054_v54 = vsel %vm3133_vm4, %v2052_v6, %v2053_v58  ;;  %v3644_v44 = vor.u32 %v1281_v57, %v1278_v43  ;;  %v1889_v6 = vrot.slane %v1887_v33, 7 }
 0x110   : > { %v1466_v48 = vsel %vm3038_vm12, %v1464_v29, %v1465_v38  ;;  %v819_v29 = vrot.slane %v817_v34, 4 }
 0x111   : > { %1932 = vrot.lane.b32.xlu0 %v1801_v39, %s2823_s22  ;;  %v711_v10 = vpop.permute.xlu1 %710  ;;  %v1627_v39 = vrot.slane %v1625_v22, 4  ;;  %v1283_v14 = vsel %vm3017_vm9, %v1274_v49, %v3644_v44 }
 0x112   : > { %753 = vst.msk [vmem:[#allocation3 + $0x30] sm:$0xf] %vm740_vm5, %v711_v10  ;;  %1930 = vrot.lane.b32.xlu2 %v1791_v8, %s2823_s22  ;;  %v1894_v10 = vshrl.u32 %v1728_v1, 16 }
 0x113   : > { %v1311_v23 = vpop.permute.xlu0 %1310  ;;  %922 = vst.msk [vmem:[#allocation3 + $0x30] sm:$0xf] %vm909_vm7, %v880_v24  ;;  %v1886_v24 = vrot.slane %v1884_v25, 6  ;;  %v1629_v8 = vsel %vm3038_vm12, %v1627_v39, %v1628_v27 }
 0x114   : > { %1362 = vst.msk [vmem:[#allocation3 + $0xc] sm:$0xf] %vm1358_vm11, %v1311_v23  ;;  %v1646_v15 = vpop.permute.xlu2 %1645  ;;  %v1896_v57 = vrot.slane %v1894_v10, 6  ;;  %v1899_v23 = vrot.slane %v1897_v40, 7  ;;  %v3688_v40 = vld [vmem:[#allocation2 + $0x50] sm:$0xf] }
 0x115   : > { %v1890_v43 = vor.u32 %v1889_v6, %v1886_v24  ;;  %v766_v24 = vld [vmem:[#allocation2 + $0x1c] sm:$0xf]  ;;  %v2080_v6 = vrot.slane %v2010_v3, 7 }
 0x116   : > { %v3669_v33 = vor.u32 %v1899_v23, %v1896_v57  ;;  %v1101_v23 = vld [vmem:[#allocation2 + $0x24] sm:$0xf] }
 0x117   : > { %2101 = vrot.lane.b32.xlu1 %v2054_v54, %s2824_s23  ;;  %v1461_v54 = vrot.slane %v1459_v55, 4  ;;  %v1892_v25 = vrot.slane %v1890_v43, 4  ;;  %v3677_v55 = vld [vmem:[#allocation2 + $0x50] sm:$0xf] }
 0x118   : > { %v1631_v10 = vrot.slane %v3677_v55, 6 }
 0x119   : > { %2099 = vrot.lane.b32.xlu0 %v2051_v56, %s2824_s23  ;;  %v1480_v21 = vpop.permute.xlu1 %1479  ;;  %v1882_v56 = vrot.slane %v3434_v52, 4  ;;  %v1463_v49 = vsel %vm3038_vm12, %v1461_v54, %v1462_v42  ;;  %v1630_v42 = vrot.slane %v1628_v27, 4  ;;  %v2083_v27 = vrot.slane %v3688_v40, 7 }
 0x11a   : > { %1531 = vst.msk [vmem:[#allocation3 + $0xc] sm:$0xf] %vm1527_vm13, %v1480_v21  ;;  %1334 = vrot.lane.b32.xlu2 %v1283_v14, %s2819_s18  ;;  %v820_v14 = vrot.slane %v766_v24, 5  ;;  %v668_v24 = vrot.slane %v666_v18, 4 }
 0x11b   : > { %v1478_v22 = vpop.permute.xlu0 %1477  ;;  %1697 = vst.msk [vmem:[#allocation3 + $0xc] sm:$0xf] %vm1693_vm14, %v1646_v15  ;;  %v1901_v15 = vsel %vm3115_vm15, %v1892_v25, %v3669_v33  ;;  %v1891_v52 = vsel %vm3115_vm15, %v1882_v56, %v1890_v43  ;;  %v2082_v43 = vrot.slane %v2080_v6, 4  ;;  %v1632_v57 = vsel %vm3038_vm12, %v1630_v42, %v1631_v10 }
 0x11c   : > { %1530 = vst.msk [vmem:[#allocation3 + $0x8] sm:$0xf] %vm1527_vm13, %v1478_v22  ;;  %v1927_v11 = vpop.permute.xlu2 %1926  ;;  %v821_v34 = vsel %vm2996_vm6, %v819_v29, %v820_v14  ;;  %v1186_v25 = vshrl.u32 %v1101_v23, 16  ;;  %v985_v42 = vrot.slane %v983_v53, 4  ;;  %v669_v53 = vor.u32 %v668_v24, %v3549_v41 }
 0x11d   : > { %v2084_v56 = vsel %vm3133_vm4, %v2082_v43, %v2083_v27 }
 0x11e   : > { %v1188_v29 = vrot.slane %v1186_v25, 5  ;;  %v822_v25 = vrot.slane %v820_v14, 4 }
 0x11f   : > { %1667 = vrot.lane.b32.xlu1 %v1629_v8, %s2822_s21  ;;  %v935_v8 = vld [vmem:[#allocation2 + $0x24] sm:$0xf] }
 0x120   : > { %v986_v54 = vrot.slane %v935_v8, 5  ;;  %v2081_v8 = vsel %vm3133_vm4, %v2079_v45, %v2080_v6  ;;  %v670_v45 = vrot.slane %v669_v53, 4 }
 0x121   : > { %1503 = vrot.lane.b32.xlu0 %v1466_v48, %s2821_s20  ;;  %v1644_v1 = vpop.permute.xlu1 %1643 }
 0x122   : > { %1696 = vst.msk [vmem:[#allocation3 + $0x8] sm:$0xf] %vm1693_vm14, %v1644_v1  ;;  %1501 = vrot.lane.b32.xlu2 %v1463_v49, %s2821_s20  ;;  %v1189_v1 = vshll.u32 %v1101_v23, 16  ;;  %v988_v3 = vrot.slane %v986_v54, 4 }
 0x123   : > { %v882_v39 = vpop.permute.xlu0 %881  ;;  %1979 = vst.msk [vmem:[#allocation3 + $0x8] sm:$0xf] %vm1976_vm10, %v1927_v11  ;;  %v3704_v11 = vld [vmem:[#allocation2 + $0x28] sm:$0xf] }
 0x124   : > { %923 = vst.msk [vmem:[#allocation3 + $0x34] sm:$0xf] %vm909_vm7, %v882_v39  ;;  %v1331_v21 = vpop.permute.xlu2 %1330  ;;  %v1102_v39 = vld [vmem:[#allocation2 + $0x28] sm:$0xf] }
 0x125   : > { %v1196_v9 = vshrl.u32 %v1102_v39, 16  ;;  %v1199_v16 = vshll.u32 %v1102_v39, 16  ;;  %v1384_v39 = vld [vmem:[#allocation2 + $0x24] sm:$0xf] }
 0x127   : > { %1952 = vrot.lane.b32.xlu1 %v1901_v15, %s2823_s22  ;;  %v989_v15 = vrot.slane %v3704_v11, 5  ;;  %v1198_v6 = vrot.slane %v1196_v9, 5  ;;  %v1184_v9 = vrot.slane %v3505_v59, 4  ;;  %v1386_v11 = vld [vmem:[#allocation2 + $0x2c] sm:$0xf] }
 0x129   : > { %1950 = vrot.lane.b32.xlu0 %v1891_v52, %s2823_s22  ;;  %v1048_v22 = vpop.permute.xlu1 %1047  ;;  %v990_v28 = vsel %vm2996_vm6, %v988_v3, %v989_v15 }
 0x12a   : > { %1089 = vst.msk [vmem:[#allocation3 + $0x34] sm:$0xf] %vm1075_vm8, %v1048_v22  ;;  %1669 = vrot.lane.b32.xlu2 %v1632_v57, %s2822_s21  ;;  %v1191_v22 = vrot.slane %v1189_v1, 6  ;;  %v3722_v57 = vld [vmem:[#allocation2 + $0x20] sm:$0xf] }
 0x12b   : > { %v1046_v48 = vpop.permute.xlu0 %1045  ;;  %1372 = vst.msk [vmem:[#allocation3 + $0x34] sm:$0xf] %vm1358_vm11, %v1331_v21  ;;  %v497_v21 = vld [vmem:[#allocation2 + $0x44] sm:$0xf]  ;;  %v823_v1 = vrot.slane %v3722_v57, 5 }
 0x12c   : > { %1088 = vst.msk [vmem:[#allocation3 + $0x30] sm:$0xf] %vm1075_vm8, %v1046_v48  ;;  %v1498_v49 = vpop.permute.xlu2 %1497  ;;  %v672_v23 = vshll.u32 %v497_v21, 16  ;;  %v987_v48 = vsel %vm2996_vm6, %v985_v42, %v986_v54  ;;  %v1192_v18 = vor.u32 %v1191_v22, %v1188_v29  ;;  %v676_v54 = vshrl.u32 %v497_v21, 16  ;;  %v3746_v22 = vld [vmem:[#allocation2 + $0x28] sm:$0xf] }
 0x12d   : > { %v824_v14 = vsel %vm2996_vm6, %v822_v25, %v823_v1  ;;  %v1438_v29 = vrot.slane %v1384_v39, 6  ;;  %v1441_v53 = vrot.slane %v3746_v22, 6  ;;  %v1103_v57 = vld [vmem:[#allocation2 + $0x2c] sm:$0xf] }
 0x12e   : > { %v1194_v3 = vrot.slane %v1192_v18, 4  ;;  %v1193_v59 = vsel %vm3017_vm9, %v1184_v9, %v1192_v18 }
 0x12f   : > { %867 = vrot.lane.b32.xlu1 %v821_v34, %s2818_s17  ;;  %v1201_v34 = vrot.slane %v1199_v16, 6  ;;  %v678_v16 = vrot.slane %v676_v54, 4  ;;  %v459_v54 = vld [vmem:[#allocation2 + $0x3c] sm:$0xf] }
 0x130   : > { %477 = vst.msk [vmem:[#allocation3 + $0x3c] sm:$0xf] %vm407_vm0, %v459_v54  ;;  %v849_v54 = vrot.slane %v847_v37, 4 }
 0x131   : > { %2121 = vrot.lane.b32.xlu0 %v2084_v56, %s2824_s23  ;;  %v1329_v52 = vpop.permute.xlu1 %1328  ;;  %v3737_v24 = vor.u32 %v1201_v34, %v1198_v6  ;;  %v1437_v6 = vrot.slane %v1435_v7, 4  ;;  %v3759_v34 = vld [vmem:[#allocation2 + $0x44] sm:$0xf]  ;;  %v3771_v7 = vld [vmem:[#allocation2 + $0x2c] sm:$0xf] }
 0x132   : > { %1371 = vst.msk [vmem:[#allocation3 + $0x30] sm:$0xf] %vm1358_vm11, %v1329_v52  ;;  %2119 = vrot.lane.b32.xlu2 %v2081_v8, %s2824_s23  ;;  %v850_v18 = vrot.slane %v3759_v34, 5  ;;  %v1604_v9 = vrot.slane %v3771_v7, 6  ;;  %v946_v34 = vld [vmem:[#allocation2 + $0x50] sm:$0x1] }
 0x133   : > { %v1929_v43 = vpop.permute.xlu0 %1928  ;;  %1540 = vst.msk [vmem:[#allocation3 + $0x30] sm:$0xf] %vm1527_vm13, %v1498_v49  ;;  %v674_v49 = vrot.slane %v672_v23, 5  ;;  %v1203_v21 = vsel %vm3017_vm9, %v1194_v3, %v3737_v24  ;;  %v777_v3 = vld [vmem:[#allocation2 + $0x48] sm:$0x1]  ;;  %v1204_v60 = vrot.slane %v3737_v24, 4 }
 0x134   : > { %1980 = vst.msk [vmem:[#allocation3 + $0xc] sm:$0xf] %vm1976_vm10, %v1929_v43  ;;  %v1666_v56 = vpop.permute.xlu2 %1665  ;;  %v498_v43 = vld [vmem:[#allocation2 + $0x48] sm:$0x1]  ;;  %v851_v37 = vsel %vm2996_vm6, %v849_v54, %v850_v18  ;;  %v1606_v5 = vrot.slane %v1604_v9, 4 }
 0x135   : > { %v675_v42 = vsel %vm2937_vm3, %v670_v45, %v674_v49  ;;  %v679_v25 = vor.u32 %v678_v16, %v674_v49  ;;  %v682_v45 = vshll.u32 %v498_v43, 16  ;;  %v1439_v49 = vsel %vm3038_vm12, %v1437_v6, %v1438_v29  ;;  %v1112_v54 = vld [vmem:[#allocation2 + $0x50] sm:$0x3] }
 0x136   : > { %v852_v16 = vrot.slane %v850_v18, 4  ;;  %v853_v43 = vrot.slane %v777_v3, 5 }
 0x137   : > { %1035 = vrot.lane.b32.xlu1 %v990_v28, %s2820_s19  ;;  %v1440_v28 = vrot.slane %v1438_v29, 4 }
 0x139   : > { %1033 = vrot.lane.b32.xlu0 %v987_v48, %s2820_s19  ;;  %v2098_v41 = vpop.permute.xlu1 %2097  ;;  %v458_v48 = vld [vmem:[#allocation2 + $0x38] sm:$0xf]  ;;  %v1442_v26 = vsel %vm3038_vm12, %v1440_v28, %v1441_v53  ;;  %v945_v28 = vld [vmem:[#allocation2 + $0x4c] sm:$0xf] }
 0x13a   : > { %2149 = vst.msk [vmem:[#allocation3 + $0xc] sm:$0xf] %vm2145_vm1, %v2098_v41  ;;  %869 = vrot.lane.b32.xlu2 %v824_v14, %s2818_s17  ;;  %v680_v14 = vrot.slane %v679_v25, 4  ;;  %v1111_v25 = vld [vmem:[#allocation2 + $0x4c] sm:$0xf] }
 0x13b   : > { %v2096_v52 = vpop.permute.xlu0 %2095  ;;  %476 = vst.msk [vmem:[#allocation3 + $0x38] sm:$0xf] %vm407_vm0, %v458_v48  ;;  %v1719_v48 = vld [vmem:[#allocation2 + $0x2c] sm:$0xf]  ;;  %v1286_v3 = vshrl.u32 %v1111_v25, 16 }
 0x13c   : > { %2148 = vst.msk [vmem:[#allocation3 + $0x8] sm:$0xf] %vm2145_vm1, %v2096_v52  ;;  %v2116_v8 = vpop.permute.xlu2 %2115  ;;  %v684_v52 = vrot.slane %v682_v45, 5  ;;  %v1804_v45 = vshrl.u32 %v1719_v48, 16  ;;  %v1807_v31 = vshll.u32 %v1719_v48, 16 }
 0x13f   : > { %718 = vrot.lane.b32.xlu1 %v675_v42, %s2817_s16  ;;  %v429_v42 = vld [vmem:[%s3307_s14 + $0xc] sm:$0xf] }
 0x140   : > { %438 = vst.msk [vmem:[#allocation2 + $0x54] sm:$0xf] %vm407_vm0, %v429_v42 }
 0x141   : > { %1318 = vrot.lane.b32.xlu0 %v1203_v21, %s2819_s18  ;;  %v1664_v23 = vpop.permute.xlu1 %1663  ;;  %v1603_v21 = vrot.slane %v1601_v4, 4 }
 0x142   : > { %1706 = vst.msk [vmem:[#allocation3 + $0x30] sm:$0xf] %vm1693_vm14, %v1664_v23  ;;  %1316 = vrot.lane.b32.xlu2 %v1193_v59, %s2819_s18  ;;  %v685_v23 = vsel %vm2937_vm3, %v680_v14, %v684_v52  ;;  %v1016_v59 = vrot.slane %v945_v28, 5  ;;  %v1289_v14 = vshll.u32 %v1111_v25, 16  ;;  %v1806_v52 = vrot.slane %v1804_v45, 6 }
 0x143   : > { %v1500_v41 = vpop.permute.xlu0 %1499  ;;  %v2710_v39 = vld [vmem:[#allocation3 + $0x8] sm:$0xff]  ;;  %v1605_v6 = vsel %vm3038_vm12, %v1603_v21, %v1604_v9  ;;  %v1288_v28 = vrot.slane %v1286_v3, 5  ;;  %vm2437_vm3 = vcmask 1043456  }
 0x144   : > { %1541 = vst.msk [vmem:[#allocation3 + $0x34] sm:$0xf] %vm1527_vm13, %v1500_v41  ;;  %2684 = vmatmul.msk.bf16.gmra.mxu0 %vm2247_vm2, %v2710_v39  ;;  %v854_v41 = vsel %vm2996_vm6, %v852_v16, %v853_v43  ;;  %v1720_v39 = vld [vmem:[#allocation2 + $0x30] sm:$0xf]  ;;  %v1018_v7 = vrot.slane %v1016_v59, 4  ;;  %v1017_v46 = vsel %vm2996_vm6, %v1015_v50, %v1016_v59 }
 0x145   : > { %1707 = vst.msk [vmem:[#allocation3 + $0x34] sm:$0xf] %vm1693_vm14, %v1666_v56  ;;  %v866_v56 = vpop.permute.xlu2 %865  ;;  %v1814_v42 = vshrl.u32 %v1720_v39, 16  ;;  %v1817_v21 = vshll.u32 %v1720_v39, 16  ;;  %v3807_v16 = vld [vmem:[#allocation2 + $0x30] sm:$0xf] }
 0x146   : > { %915 = vst.msk [vmem:[#allocation3 + $0x14] sm:$0xf] %vm909_vm7, %v866_v56  ;;  %v1809_v56 = vrot.slane %v1807_v31, 7  ;;  %v1607_v18 = vrot.slane %v3807_v16, 6  ;;  %v2002_v39 = vld [vmem:[#allocation2 + $0x2c] sm:$0xf] }
 0x147   : > { %1487 = vrot.lane.b32.xlu1 %v1442_v26, %s2821_s20  ;;  %v1816_v61 = vrot.slane %v1814_v42, 6  ;;  %v2404_v42 = vld [vmem:[%s4179_s5] sm:$0xf] }
 0x148   : > { %v1810_v48 = vor.u32 %v1809_v56, %v1806_v52  ;;  %v1608_v9 = vsel %vm3038_vm12, %v1606_v5, %v1607_v18  ;;  %v1296_v52 = vshrl.u32 %v1112_v54, 16  ;;  %v1299_v56 = vshll.u32 %v1112_v54, 16 }
 0x149   : > { %1485 = vrot.lane.b32.xlu0 %v1439_v49, %s2821_s20  ;;  %v1949_v29 = vpop.permute.xlu1 %1948  ;;  %v1019_v49 = vrot.slane %v946_v34, 5  ;;  %v1284_v34 = vrot.slane %v3644_v44, 4 }
 0x14a   : > { %1990 = vst.msk [vmem:[#allocation3 + $0x34] sm:$0xf] %vm1976_vm10, %v1949_v29  ;;  %720 = vrot.lane.b32.xlu2 %v685_v23, %s2817_s16  ;;  %v1291_v23 = vrot.slane %v1289_v14, 6  ;;  %v1812_v31 = vrot.slane %v1810_v48, 4  ;;  %v3838_v14 = vld [vmem:[#allocation2 + $0x30] sm:$0xf] }
 0x14b   : > { %v1947_v4 = vpop.permute.xlu0 %1946  ;;  %v1020_v43 = vsel %vm2996_vm6, %v1018_v7, %v1019_v49  ;;  %v2056_v49 = vrot.slane %v2002_v39, 7 }
 0x14c   : > { %1989 = vst.msk [vmem:[#allocation3 + $0x30] sm:$0xf] %vm1976_vm10, %v1947_v4  ;;  %v1819_v4 = vrot.slane %v1817_v21, 7  ;;  %v3818_v25 = vor.u32 %v1291_v23, %v1288_v28  ;;  %v2439_v21 = vsel %vm2437_vm3, %v2404_v42, 0  ;;  %v1298_v23 = vrot.slane %v1296_v52, 5 }
 0x14d   : > { %2158 = vst.msk [vmem:[#allocation3 + $0x30] sm:$0xf] %vm2145_vm1, %v2116_v8  ;;  %v1313_v26 = vpop.permute.xlu2 %1312  ;;  %v2058_v50 = vrot.slane %v2056_v49, 4  ;;  %2448 = vmatpush.bf16.msra.mxu1 %v2439_v21  ;;  %2723 = vmatpush.bf16.msra.mxu3 %v2439_v21  ;;  %vm2409_vm3 = vcmask 64512  }
 0x14e   : > { %v1293_v7 = vsel %vm3017_vm9, %v1284_v34, %v3818_v25 }
 0x14f   : > { %1651 = vrot.lane.b32.xlu1 %v1605_v6, %s2822_s21 }
 0x151   : > { %889 = vrot.lane.b32.xlu0 %v854_v41, %s2818_s17  ;;  %v864_v8 = vpop.permute.xlu1 %863  ;;  %v3822_v41 = vor.u32 %v1819_v4, %v1816_v61  ;;  %v1301_v61 = vrot.slane %v1299_v56, 6 }
 0x152   : > { %914 = vst.msk [vmem:[#allocation3 + $0x10] sm:$0xf] %vm909_vm7, %v864_v8  ;;  %887 = vrot.lane.b32.xlu2 %v851_v37, %s2818_s17  ;;  %v1802_v8 = vrot.slane %v3607_v32, 4  ;;  %v2059_v37 = vrot.slane %v3838_v14, 7  ;;  %v1729_v32 = vld [vmem:[#allocation2 + $0x54] sm:$0xf] }
 0x153   : > { %v2118_v29 = vpop.permute.xlu0 %2117  ;;  %v1821_v3 = vsel %vm3115_vm15, %v1812_v31, %v3822_v41  ;;  %v1904_v34 = vshrl.u32 %v1729_v32, 16  ;;  %v1907_v2 = vshll.u32 %v1729_v32, 16  ;;  %v1294_v31 = vrot.slane %v3818_v25, 4 }
 0x154   : > { %2159 = vst.msk [vmem:[#allocation3 + $0x34] sm:$0xf] %vm2145_vm1, %v2118_v29  ;;  %v1811_v28 = vsel %vm3115_vm15, %v1802_v8, %v1810_v48  ;;  %v2060_v5 = vsel %vm3133_vm4, %v2058_v50, %v2059_v37  ;;  %v1302_v39 = vor.u32 %v1301_v61, %v1298_v23  ;;  %v1467_v32 = vrot.slane %v1465_v38, 4 }
 0x155   : > { %v717_v6 = vpop.permute.xlu2 %716  ;;  %v1822_v30 = vrot.slane %v3822_v41, 4 }
 0x156   : > { %756 = vst.msk [vmem:[#allocation3 + $0x3c] sm:$0xf] %vm740_vm5, %v717_v6  ;;  %v1563_v6 = vld [vmem:[#allocation2 + $0x54] sm:$0xf]  ;;  %v1303_v42 = vsel %vm3017_vm9, %v1294_v31, %v1302_v39 }
 0x157   : > { %1055 = vrot.lane.b32.xlu1 %v1020_v43, %s2820_s19  ;;  %v2055_v43 = vrot.slane %v2053_v58, 4  ;;  %v1730_v58 = vld [vmem:[#allocation2 + $0x58] sm:$0x7] }
 0x158   : > { %v1914_v8 = vshrl.u32 %v1730_v58, 16  ;;  %v1917_v52 = vshll.u32 %v1730_v58, 16  ;;  %v768_v58 = vld [vmem:[#allocation2 + $0x24] sm:$0xf] }
 0x159   : > { %1053 = vrot.lane.b32.xlu0 %v1017_v46, %s2820_s19  ;;  %v1032_v45 = vpop.permute.xlu1 %1031  ;;  %v1394_v46 = vld [vmem:[#allocation2 + $0x4c] sm:$0xf]  ;;  %v2057_v48 = vsel %vm3133_vm4, %v2055_v43, %v2056_v49 }
 0x15a   : > { %1081 = vst.msk [vmem:[#allocation3 + $0x14] sm:$0xf] %vm1075_vm8, %v1032_v45  ;;  %1653 = vrot.lane.b32.xlu2 %v1608_v9, %s2822_s21  ;;  %v1468_v45 = vrot.slane %v1394_v46, 6  ;;  %v1395_v9 = vld [vmem:[#allocation2 + $0x50] sm:$0x3]  ;;  %v1916_v21 = vrot.slane %v1914_v8, 6 }
 0x15b   : > { %v1030_v59 = vpop.permute.xlu0 %1029  ;;  %v2715_v44 = vld [vmem:[#allocation3 + $0x30] sm:$0xff]  ;;  %v1471_v25 = vrot.slane %v1395_v9, 6  ;;  %v1919_v50 = vrot.slane %v1917_v52, 7 }
 0x15c   : > { %1080 = vst.msk [vmem:[#allocation3 + $0x10] sm:$0xf] %vm1075_vm8, %v1030_v59  ;;  %2689 = vmatmul.msk.bf16.gmra.mxu2 %vm2247_vm2, %v2715_v44  ;;  %v1633_v59 = vrot.slane %v1631_v10, 4  ;;  %v1634_v44 = vrot.slane %v1563_v6, 6  ;;  %v1470_v49 = vrot.slane %v1468_v45, 4  ;;  %v1469_v20 = vsel %vm3038_vm12, %v1467_v32, %v1468_v45 }
 0x15d   : > { %1363 = vst.msk [vmem:[#allocation3 + $0x10] sm:$0xf] %vm1358_vm11, %v1313_v26  ;;  %v884_v26 = vpop.permute.xlu2 %883  ;;  %v1920_v23 = vor.u32 %v1919_v50, %v1916_v21  ;;  %v3885_v46 = vld [vmem:[%s4177_s3] ss:$0 sm:$0xff]  ;;  %v2012_v6 = vld [vmem:[#allocation2 + $0x54] sm:$0xf] }
 0x15e   : > { %v1635_v55 = vsel %vm3038_vm12, %v1633_v59, %v1634_v44  ;;  %v1636_v31 = vrot.slane %v1634_v44, 4  ;;  %v3901_v9 = vld [vmem:[%s4178_s4] ss:$0 sm:$0xff]  ;;  %v2013_v59 = vld [vmem:[#allocation2 + $0x58] sm:$0x7]  ;;  %v1209_v32 = vshll.u32 %v1103_v57, 16 }
 0x15f   : > { %1336 = vrot.lane.b32.xlu1 %v1293_v7, %s2819_s18  ;;  %v1906_v7 = vrot.slane %v1904_v34, 6  ;;  %v1564_v34 = vld [vmem:[#allocation2 + $0x58] sm:$0x3]  ;;  %v937_v44 = vld [vmem:[#allocation2 + $0x2c] sm:$0xf] }
 0x160   : > { %v1637_v39 = vrot.slane %v1564_v34, 6  ;;  %v1211_v34 = vrot.slane %v1209_v32, 6 }
 0x161   : > { %1936 = vrot.lane.b32.xlu0 %v1821_v3, %s2823_s22  ;;  %v715_v29 = vpop.permute.xlu1 %714  ;;  %v1909_v3 = vrot.slane %v1907_v2, 7 }
 0x162   : > { %755 = vst.msk [vmem:[#allocation3 + $0x38] sm:$0xf] %vm740_vm5, %v715_v29  ;;  %1934 = vrot.lane.b32.xlu2 %v1811_v28, %s2823_s22  ;;  %v1472_v29 = vsel %vm3038_vm12, %v1470_v49, %v1471_v25  ;;  %v2089_v49 = vrot.slane %v2013_v59, 7  ;;  %v1638_v25 = vsel %vm3038_vm12, %v1636_v31, %v1637_v39  ;;  %v1443_v31 = vrot.slane %v1441_v53, 4 }
 0x163   : > { %v1315_v4 = vpop.permute.xlu0 %1314  ;;  %924 = vst.msk [vmem:[#allocation3 + $0x38] sm:$0xf] %vm909_vm7, %v884_v26  ;;  %v1910_v10 = vor.u32 %v1909_v3, %v1906_v7  ;;  %v825_v7 = vrot.slane %v823_v1, 4  ;;  %v826_v3 = vrot.slane %v768_v58, 5  ;;  %v1444_v39 = vrot.slane %v1386_v11, 6 }
 0x164   : > { %1364 = vst.msk [vmem:[#allocation3 + $0x14] sm:$0xf] %vm1358_vm11, %v1315_v4  ;;  %v4198_v59 = vrot.slane %v3060_v47, 5 }
 0x165   : > { %v1650_v54 = vpop.permute.xlu2 %1649  ;;  %v1912_v28 = vrot.slane %v1910_v10, 4  ;;  %v827_v1 = vsel %vm2996_vm6, %v825_v7, %v826_v3  ;;  %v1445_v22 = vsel %vm3038_vm12, %v1443_v31, %v1444_v39  ;;  %v1446_v32 = vrot.slane %v1444_v39, 4 }
 0x166   : > { %v4201_v31 = vrot.slane %v3207_v12, 7 }
 0x167   : > { %2105 = vrot.lane.b32.xlu1 %v2060_v5, %s2824_s23  ;;  %v1902_v5 = vrot.slane %v3669_v33, 4  ;;  %v1921_v2 = vsel %vm3115_vm15, %v1912_v28, %v1920_v23  ;;  %v2086_v33 = vrot.slane %v2012_v6, 7 }
 0x169   : > { %2103 = vrot.lane.b32.xlu0 %v2057_v48, %s2824_s23  ;;  %v1484_v56 = vpop.permute.xlu1 %1483  ;;  %v1911_v48 = vsel %vm3115_vm15, %v1902_v5, %v1910_v10  ;;  %v992_v10 = vrot.slane %v937_v44, 5 }
 0x16a   : > { %1533 = vst.msk [vmem:[#allocation3 + $0x14] sm:$0xf] %vm1527_vm13, %v1484_v56  ;;  %1338 = vrot.lane.b32.xlu2 %v1303_v42, %s2819_s18  ;;  %v2088_v56 = vrot.slane %v2086_v33, 4 }
 0x16b   : > { %v1482_v26 = vpop.permute.xlu0 %1481  ;;  %1699 = vst.msk [vmem:[#allocation3 + $0x14] sm:$0xf] %vm1693_vm14, %v1650_v54 }
 0x16c   : > { %1532 = vst.msk [vmem:[#allocation3 + $0x10] sm:$0xf] %vm1527_vm13, %v1482_v26  ;;  %v2090_v50 = vsel %vm3133_vm4, %v2088_v56, %v2089_v49 }
 0x16d   : > { %v1931_v43 = vpop.permute.xlu2 %1930 }
 0x16f   : > { %1671 = vrot.lane.b32.xlu1 %v1635_v55, %s2822_s21 }
 0x171   : > { %1507 = vrot.lane.b32.xlu0 %v1472_v29, %s2821_s20  ;;  %v1648_v61 = vpop.permute.xlu1 %1647  ;;  %v2288_v4 = vpop.f32.mrf.mxu0  ;;  %v1206_v29 = vshrl.u32 %v1103_v57, 16 }
 0x172   : > { %1698 = vst.msk [vmem:[#allocation3 + $0x10] sm:$0xf] %vm1693_vm14, %v1648_v61  ;;  %1505 = vrot.lane.b32.xlu2 %v1469_v20, %s2821_s20  ;;  %v2337_v45 = vmul.f32 %v3885_v46, %v2288_v4  ;;  %v994_v4 = vrot.slane %v992_v10, 4 }
 0x173   : > { %v886_v38 = vpop.permute.xlu0 %885  ;;  %1981 = vst.msk [vmem:[#allocation3 + $0x10] sm:$0xf] %vm1976_vm10, %v1931_v43  ;;  %v2085_v43 = vrot.slane %v2083_v27, 4  ;;  %v1208_v6 = vrot.slane %v1206_v29, 5 }
 0x174   : > { %925 = vst.msk [vmem:[#allocation3 + $0x3c] sm:$0xf] %vm909_vm7, %v886_v38  ;;  %v2359_v42 = vadd.f32 %v3901_v9, %v2337_v45  ;;  %v991_v38 = vrot.slane %v989_v15, 4  ;;  %v1555_v45 = vld [vmem:[#allocation2 + $0x34] sm:$0xf] }
 0x175   : > { %v1335_v54 = vpop.permute.xlu2 %1334  ;;  %v2087_v40 = vsel %vm3133_vm4, %v2085_v43, %v2086_v33  ;;  %v1212_v58 = vor.u32 %v1211_v34, %v1208_v6  ;;  %v1610_v53 = vrot.slane %v1555_v45, 6 }
 0x176   : > { %v2377_v28 = vmax.f32 %v2359_v42, 0.0  ;;  %v993_v15 = vsel %vm2996_vm6, %v991_v38, %v992_v10  ;;  %v461_v10 = vld [vmem:[#allocation2 + $0x44] sm:$0xf]  ;;  %v4200_v38 = vrot.slane %v3159_v62, 6 }
 0x177   : > { %1956 = vrot.lane.b32.xlu1 %v1921_v2, %s2823_s22  ;;  %v996_v2 = vsel %vm2996_vm6, %v994_v4, %v995_v63  ;;  %v1214_v63 = vrot.slane %v1212_v58, 4  ;;  %v1213_v24 = vsel %vm3017_vm9, %v1204_v60, %v1212_v58  ;;  %479 = vst.msk [vmem:[#allocation3 + $0x44] sm:$0xf] %vm407_vm0, %v461_v10 }
 0x178   : > { %v1448_v6 = vsel %vm3038_vm12, %v1446_v32, %v4200_v38 }
 0x179   : > { %1954 = vrot.lane.b32.xlu0 %v1911_v48, %s2823_s22  ;;  %v1052_v8 = vpop.permute.xlu1 %1051  ;;  %v2290_v52 = vpop.f32.mrf.mxu0  ;;  %v828_v48 = vrot.slane %v826_v3, 4  ;;  %v1721_v3 = vld [vmem:[#allocation2 + $0x34] sm:$0xf]  ;;  %v1223_v44 = vsel %vm3017_vm9, %v1214_v63, %v3098_v35 }
 0x17a   : > { %1091 = vst.msk [vmem:[#allocation3 + $0x3c] sm:$0xf] %vm1075_vm8, %v1052_v8  ;;  %v2338_v55 = vmul.f32 %v3885_v46, %v2290_v52  ;;  %1673 = vrot.lane.b32.xlu2 %v1638_v25, %s2822_s21  ;;  %v460_v8 = vld [vmem:[#allocation2 + $0x40] sm:$0xf]  ;;  %v1824_v52 = vshrl.u32 %v1721_v3, 16  ;;  %v1827_v47 = vshll.u32 %v1721_v3, 16 }
 0x17b   : > { %v1050_v26 = vpop.permute.xlu0 %1049  ;;  %1374 = vst.msk [vmem:[#allocation3 + $0x3c] sm:$0xf] %vm1358_vm11, %v1335_v54  ;;  %v830_v54 = vsel %vm2996_vm6, %v828_v48, %v4198_v59  ;;  %v1612_v25 = vrot.slane %v1610_v53, 4 }
 0x17c   : > { %1090 = vst.msk [vmem:[#allocation3 + $0x38] sm:$0xf] %vm1075_vm8, %v1050_v26  ;;  %v2360_v21 = vadd.f32 %v3901_v9, %v2338_v55  ;;  %v1609_v26 = vrot.slane %v1607_v18, 4  ;;  %v1826_v35 = vrot.slane %v1824_v52, 6  ;;  %v1829_v55 = vrot.slane %v1827_v47, 7 }
 0x17d   : > { %v1502_v61 = vpop.permute.xlu2 %1501  ;;  %478 = vst.msk [vmem:[#allocation3 + $0x40] sm:$0xf] %vm407_vm0, %v460_v8  ;;  %vm2495_vm0 = vcmask 23552  }
 0x17e   : > { %v2378_v23 = vmax.f32 %v2360_v21, 0.0  ;;  %v4199_v21 = vrot.slane %v3130_v17, 6  ;;  %v1611_v16 = vsel %vm3038_vm12, %v1609_v26, %v1610_v53  ;;  %v1830_v18 = vor.u32 %v1829_v55, %v1826_v35 }
 0x17f   : > { %871 = vrot.lane.b32.xlu1 %v827_v1, %s2818_s17 }
 0x180   : > { %v2395_v20 = vpack.c.bf16 %v2378_v23, %v2377_v28  ;;  %v2061_v28 = vrot.slane %v2059_v37, 4  ;;  %v2062_v23 = vrot.slane %v2004_v13, 7  ;;  %v1831_v58 = vsel %vm3115_vm15, %v1822_v30, %v1830_v18  ;;  %v4063_v30 = vld [vmem:[%s4180_s6] ss:$0 sm:$0xff] }
 0x181   : > { %2125 = vrot.lane.b32.xlu0 %v2090_v50, %s2824_s23  ;;  %v1333_v5 = vpop.permute.xlu1 %1332  ;;  %v1614_v50 = vsel %vm3038_vm12, %v1612_v25, %v4199_v21 }
 0x182   : > { %1373 = vst.msk [vmem:[#allocation3 + $0x38] sm:$0xf] %vm1358_vm11, %v1333_v5  ;;  %2692 = vmatmul.msk.bf16.vlgmr.msra.gmra.mxu1 %vm2409_vm3, %v2395_v20  ;;  %2123 = vrot.lane.b32.xlu2 %v2087_v40, %s2824_s23  ;;  %v1832_v20 = vrot.slane %v1830_v18, 4  ;;  %v2063_v34 = vsel %vm3133_vm4, %v2061_v28, %v2062_v23 }
 0x183   : > { %v1933_v27 = vpop.permute.xlu0 %1932  ;;  %1542 = vst.msk [vmem:[#allocation3 + $0x38] sm:$0xf] %vm1527_vm13, %v1502_v61 }
 0x184   : > { %1982 = vst.msk [vmem:[#allocation3 + $0x14] sm:$0xf] %vm1976_vm10, %v1933_v27  ;;  %v1841_v62 = vsel %vm3115_vm15, %v1832_v20, %v3181_v36  ;;  %v2064_v36 = vrot.slane %v2062_v23, 4 }
 0x185   : > { %v1670_v33 = vpop.permute.xlu2 %1669 }
 0x186   : > { %v2066_v39 = vsel %vm3133_vm4, %v2064_v36, %v4201_v31 }
 0x187   : > { %1039 = vrot.lane.b32.xlu1 %v996_v2, %s2820_s19 }
 0x189   : > { %1037 = vrot.lane.b32.xlu0 %v993_v15, %s2820_s19  ;;  %v2102_v51 = vpop.permute.xlu1 %2101 }
 0x18a   : > { %2151 = vst.msk [vmem:[#allocation3 + $0x14] sm:$0xf] %vm2145_vm1, %v2102_v51  ;;  %873 = vrot.lane.b32.xlu2 %v830_v54, %s2818_s17  ;;  %s2725_s17 = smul.u32 36, %s4213_s25 }
 0x18b   : > { %v2100_v7 = vpop.permute.xlu0 %2099 }
 0x18c   : > { %2150 = vst.msk [vmem:[#allocation3 + $0x10] sm:$0xf] %vm2145_vm1, %v2100_v7 }
 0x18d   : > { %v2120_v56 = vpop.permute.xlu2 %2119 }
 0x18f   : > { %1489 = vrot.lane.b32.xlu1 %v1445_v22, %s2821_s20  ;;  %v2313_v49 = vpop.f32.mrf.mxu2 }
 0x190   : > { %v2347_v29 = vmul.f32 %v3885_v46, %v2313_v49 }
 0x191   : > { %1322 = vrot.lane.b32.xlu0 %v1223_v44, %s2819_s18  ;;  %v1668_v42 = vpop.permute.xlu1 %1667 }
 0x192   : > { %1708 = vst.msk [vmem:[#allocation3 + $0x38] sm:$0xf] %vm1693_vm14, %v1668_v42  ;;  %1320 = vrot.lane.b32.xlu2 %v1213_v24, %s2819_s18  ;;  %v2369_v61 = vadd.f32 %v3901_v9, %v2347_v29  ;;  %s384_s18 = sadd.s32 %s2725_s17, %s4217_s8 }
 0x193   : > { %v1504_v57 = vpop.permute.xlu0 %1503  ;;  %v2711_v1 = vld [vmem:[#allocation3 + $0x10] sm:$0xff]  ;;  %s2633_s19 = sshll.u32 %s384_s18, 3 }
 0x194   : > { %1543 = vst.msk [vmem:[#allocation3 + $0x3c] sm:$0xf] %vm1527_vm13, %v1504_v57  ;;  %2685 = vmatmul.msk.bf16.gmra.mxu0 %vm2247_vm2, %v2711_v1  ;;  %v2387_v40 = vmax.f32 %v2369_v61, 0.0 }
 0x195   : > { %1709 = vst.msk [vmem:[#allocation3 + $0x3c] sm:$0xf] %vm1693_vm14, %v1670_v33  ;;  %v870_v17 = vpop.permute.xlu2 %869 }
 0x196   : > { %917 = vst.msk [vmem:[#allocation3 + $0x1c] sm:$0xf] %vm909_vm7, %v870_v17 }
 0x197   : > { %1657 = vrot.lane.b32.xlu1 %v1614_v50, %s2822_s21  ;;  %v2315_v43 = vpop.f32.mrf.mxu2 }
 0x198   : > { %v2348_v4 = vmul.f32 %v3885_v46, %v2315_v43 }
 0x199   : > { %1655 = vrot.lane.b32.xlu0 %v1611_v16, %s2822_s21  ;;  %v1953_v5 = vpop.permute.xlu1 %1952 }
 0x19a   : > { %1992 = vst.msk [vmem:[#allocation3 + $0x3c] sm:$0xf] %vm1976_vm10, %v1953_v5  ;;  %v2370_v14 = vadd.f32 %v3901_v9, %v2348_v4  ;;  %1491 = vrot.lane.b32.xlu2 %v1448_v6, %s2821_s20 }
 0x19b   : > { %v1951_v37 = vpop.permute.xlu0 %1950 }
 0x19c   : > { %1991 = vst.msk [vmem:[#allocation3 + $0x38] sm:$0xf] %vm1976_vm10, %v1951_v37  ;;  %v2388_v27 = vmax.f32 %v2370_v14, 0.0 }
 0x19d   : > { %2160 = vst.msk [vmem:[#allocation3 + $0x38] sm:$0xf] %vm2145_vm1, %v2120_v56  ;;  %v1317_v11 = vpop.permute.xlu2 %1316 }
 0x19e   : > { %v2400_v2 = vpack.c.bf16 %v2388_v27, %v2387_v40 }
 0x19f   : > { %2107 = vrot.lane.b32.xlu1 %v2063_v34, %s2824_s23 }
 0x1a0   : > { %2697 = vmatmul.msk.bf16.vlgmr.msra.gmra.mxu3 %vm2409_vm3, %v2400_v2 }
 0x1a1   : > { %1940 = vrot.lane.b32.xlu0 %v1841_v62, %s2823_s22  ;;  %v868_v15 = vpop.permute.xlu1 %867 }
 0x1a2   : > { %916 = vst.msk [vmem:[#allocation3 + $0x18] sm:$0xf] %vm909_vm7, %v868_v15  ;;  %1938 = vrot.lane.b32.xlu2 %v1831_v58, %s2823_s22 }
 0x1a3   : > { %v2122_v48 = vpop.permute.xlu0 %2121 }
 0x1a4   : > { %2161 = vst.msk [vmem:[#allocation3 + $0x3c] sm:$0xf] %vm2145_vm1, %v2122_v48 }
 0x1a5   : > { %v721_v41 = vpop.permute.xlu2 %720 }
 0x1a6   : > { %758 = vst.msk [vmem:[#allocation3 + $0x44] sm:$0xf] %vm740_vm5, %v721_v41 }
 0x1a9   : > { %v1036_v33 = vpop.permute.xlu1 %1035 }
 0x1aa   : > { %1083 = vst.msk [vmem:[#allocation3 + $0x1c] sm:$0xf] %vm1075_vm8, %v1036_v33  ;;  %2109 = vrot.lane.b32.xlu2 %v2066_v39, %s2824_s23  ;;  %s4068_s23 = scalar_lea.vmem %s4181_s7, %s2633_s19 }
 0x1ab   : > { %v1034_v51 = vpop.permute.xlu0 %1033  ;;  %v2716_v0 = vld [vmem:[#allocation3 + $0x38] sm:$0xff] }
 0x1ac   : > { %1082 = vst.msk [vmem:[#allocation3 + $0x18] sm:$0xf] %vm1075_vm8, %v1034_v51  ;;  %2690 = vmatmul.msk.bf16.gmra.mxu2 %vm2247_vm2, %v2716_v0 }
 0x1ad   : > { %1365 = vst.msk [vmem:[#allocation3 + $0x18] sm:$0xf] %vm1358_vm11, %v1317_v11  ;;  %v888_v45 = vpop.permute.xlu2 %887 }
 0x1b1   : > { %v719_v63 = vpop.permute.xlu1 %718 }
 0x1b2   : > { %757 = vst.msk [vmem:[#allocation3 + $0x40] sm:$0xf] %vm740_vm5, %v719_v63 }
 0x1b3   : > { %v1319_v59 = vpop.permute.xlu0 %1318  ;;  %926 = vst.msk [vmem:[#allocation3 + $0x40] sm:$0xf] %vm909_vm7, %v888_v45 }
 0x1b4   : > { %1366 = vst.msk [vmem:[#allocation3 + $0x1c] sm:$0xf] %vm1358_vm11, %v1319_v59 }
 0x1b5   : > { %v1654_v19 = vpop.permute.xlu2 %1653 }
 0x1b9   : > { %v1488_v12 = vpop.permute.xlu1 %1487 }
 0x1ba   : > { %1535 = vst.msk [vmem:[#allocation3 + $0x1c] sm:$0xf] %vm1527_vm13, %v1488_v12 }
 0x1bb   : > { %v1486_v54 = vpop.permute.xlu0 %1485  ;;  %1701 = vst.msk [vmem:[#allocation3 + $0x1c] sm:$0xf] %vm1693_vm14, %v1654_v19 }
 0x1bc   : > { %1534 = vst.msk [vmem:[#allocation3 + $0x18] sm:$0xf] %vm1527_vm13, %v1486_v54 }
 0x1bd   : > { %v1935_v7 = vpop.permute.xlu2 %1934 }
 0x1c1   : > { %v1652_v3 = vpop.permute.xlu1 %1651  ;;  %v2293_v22 = vpop.f32.mrf.mxu0 }
 0x1c2   : > { %1700 = vst.msk [vmem:[#allocation3 + $0x18] sm:$0xf] %vm1693_vm14, %v1652_v3  ;;  %v2339_v8 = vmul.f32 %v3885_v46, %v2293_v22 }
 0x1c3   : > { %v890_v53 = vpop.permute.xlu0 %889  ;;  %1983 = vst.msk [vmem:[#allocation3 + $0x18] sm:$0xf] %vm1976_vm10, %v1935_v7 }
 0x1c4   : > { %927 = vst.msk [vmem:[#allocation3 + $0x44] sm:$0xf] %vm909_vm7, %v890_v53  ;;  %v2361_v60 = vadd.f32 %v3901_v9, %v2339_v8 }
 0x1c5   : > { %v1339_v44 = vpop.permute.xlu2 %1338 }
 0x1c6   : > { %v2379_v42 = vmax.f32 %v2361_v60, 0.0 }
 0x1c9   : > { %v1056_v52 = vpop.permute.xlu1 %1055  ;;  %v2295_v47 = vpop.f32.mrf.mxu0 }
 0x1ca   : > { %1093 = vst.msk [vmem:[#allocation3 + $0x44] sm:$0xf] %vm1075_vm8, %v1056_v52  ;;  %v2340_v49 = vmul.f32 %v3885_v46, %v2295_v47 }
 0x1cb   : > { %v1054_v56 = vpop.permute.xlu0 %1053  ;;  %1376 = vst.msk [vmem:[#allocation3 + $0x44] sm:$0xf] %vm1358_vm11, %v1339_v44 }
 0x1cc   : > { %1092 = vst.msk [vmem:[#allocation3 + $0x40] sm:$0xf] %vm1075_vm8, %v1054_v56  ;;  %v2362_v25 = vadd.f32 %v3901_v9, %v2340_v49 }
 0x1cd   : > { %v1506_v35 = vpop.permute.xlu2 %1505 }
 0x1ce   : > { %v2380_v26 = vmax.f32 %v2362_v25, 0.0 }
 0x1d0   : > { %v2396_v24 = vpack.c.bf16 %v2380_v26, %v2379_v42 }
 0x1d1   : > { %v1337_v55 = vpop.permute.xlu1 %1336 }
 0x1d2   : > { %1375 = vst.msk [vmem:[#allocation3 + $0x40] sm:$0xf] %vm1358_vm11, %v1337_v55  ;;  %2693 = vmatmul.msk.bf16.gmra.mxu1 %vm2409_vm3, %v2396_v24 }
 0x1d3   : > { %v1937_v57 = vpop.permute.xlu0 %1936  ;;  %1544 = vst.msk [vmem:[#allocation3 + $0x40] sm:$0xf] %vm1527_vm13, %v1506_v35 }
 0x1d4   : > { %1984 = vst.msk [vmem:[#allocation3 + $0x1c] sm:$0xf] %vm1976_vm10, %v1937_v57 }
 0x1d5   : > { %v1674_v1 = vpop.permute.xlu2 %1673 }
 0x1d9   : > { %v2106_v10 = vpop.permute.xlu1 %2105 }
 0x1da   : > { %2153 = vst.msk [vmem:[#allocation3 + $0x1c] sm:$0xf] %vm2145_vm1, %v2106_v10 }
 0x1db   : > { %v2104_v21 = vpop.permute.xlu0 %2103 }
 0x1dc   : > { %2152 = vst.msk [vmem:[#allocation3 + $0x18] sm:$0xf] %vm2145_vm1, %v2104_v21 }
 0x1dd   : > { %v2124_v50 = vpop.permute.xlu2 %2123 }
 0x1df   : > { %v2318_v29 = vpop.f32.mrf.mxu2 }
 0x1e0   : > { %v2349_v32 = vmul.f32 %v3885_v46, %v2318_v29 }
 0x1e1   : > { %v1672_v13 = vpop.permute.xlu1 %1671 }
 0x1e2   : > { %1710 = vst.msk [vmem:[#allocation3 + $0x40] sm:$0xf] %vm1693_vm14, %v1672_v13  ;;  %v2371_v28 = vadd.f32 %v3901_v9, %v2349_v32 }
 0x1e3   : > { %v1508_v16 = vpop.permute.xlu0 %1507  ;;  %v2712_v18 = vld [vmem:[#allocation3 + $0x18] sm:$0xff] }
 0x1e4   : > { %1545 = vst.msk [vmem:[#allocation3 + $0x44] sm:$0xf] %vm1527_vm13, %v1508_v16  ;;  %2686 = vmatmul.msk.bf16.gmra.mxu0 %vm2247_vm2, %v2712_v18  ;;  %v2389_v20 = vmax.f32 %v2371_v28, 0.0 }
 0x1e5   : > { %1711 = vst.msk [vmem:[#allocation3 + $0x44] sm:$0xf] %vm1693_vm14, %v1674_v1  ;;  %v874_v17 = vpop.permute.xlu2 %873 }
 0x1e6   : > { %919 = vst.msk [vmem:[#allocation3 + $0x24] sm:$0xf] %vm909_vm7, %v874_v17 }
 0x1e7   : > { %v2320_v43 = vpop.f32.mrf.mxu2 }
 0x1e8   : > { %v2350_v23 = vmul.f32 %v3885_v46, %v2320_v43 }
 0x1e9   : > { %v1957_v61 = vpop.permute.xlu1 %1956 }
 0x1ea   : > { %1994 = vst.msk [vmem:[#allocation3 + $0x44] sm:$0xf] %vm1976_vm10, %v1957_v61  ;;  %v2372_v4 = vadd.f32 %v3901_v9, %v2350_v23 }
 0x1eb   : > { %v1955_v5 = vpop.permute.xlu0 %1954 }
 0x1ec   : > { %1993 = vst.msk [vmem:[#allocation3 + $0x40] sm:$0xf] %vm1976_vm10, %v1955_v5  ;;  %v2390_v38 = vmax.f32 %v2372_v4, 0.0 }
 0x1ed   : > { %2162 = vst.msk [vmem:[#allocation3 + $0x40] sm:$0xf] %vm2145_vm1, %v2124_v50  ;;  %v1321_v34 = vpop.permute.xlu2 %1320 }
 0x1ee   : > { %v2401_v6 = vpack.c.bf16 %v2390_v38, %v2389_v20 }
 0x1f0   : > { %2698 = vmatmul.msk.bf16.gmra.mxu3 %vm2409_vm3, %v2401_v6 }
 0x1f1   : > { %v872_v14 = vpop.permute.xlu1 %871 }
 0x1f2   : > { %918 = vst.msk [vmem:[#allocation3 + $0x20] sm:$0xf] %vm909_vm7, %v872_v14 }
 0x1f3   : > { %v2126_v37 = vpop.permute.xlu0 %2125 }
 0x1f4   : > { %2163 = vst.msk [vmem:[#allocation3 + $0x44] sm:$0xf] %vm2145_vm1, %v2126_v37 }
 0x1f5   : > { %v1492_v2 = vpop.permute.xlu2 %1491 }
 0x1f9   : > { %v1040_v40 = vpop.permute.xlu1 %1039 }
 0x1fa   : > { %1085 = vst.msk [vmem:[#allocation3 + $0x24] sm:$0xf] %vm1075_vm8, %v1040_v40 }
 0x1fb   : > { %v1038_v27 = vpop.permute.xlu0 %1037  ;;  %v2717_v62 = vld [vmem:[#allocation3 + $0x40] sm:$0xff] }
 0x1fc   : > { %1084 = vst.msk [vmem:[#allocation3 + $0x20] sm:$0xf] %vm1075_vm8, %v1038_v27  ;;  %2691 = vmatmul.msk.bf16.gmra.mxu2 %vm2247_vm2, %v2717_v62 }
 0x1fd   : > { %1367 = vst.msk [vmem:[#allocation3 + $0x20] sm:$0xf] %vm1358_vm11, %v1321_v34  ;;  %v1939_v41 = vpop.permute.xlu2 %1938 }
 0x1ff   : > { %v2450_v11 = vpop.f32.mrf.mxu1 }
 0x200   : > { %v2451_v15 = vadd.f32 %v4063_v30, %v2450_v11 }
 0x201   : > { %v1490_v58 = vpop.permute.xlu1 %1489 }
 0x202   : > { %1536 = vst.msk [vmem:[#allocation3 + $0x20] sm:$0xf] %vm1527_vm13, %v1490_v58 }
 0x203   : > { %2496 = vst.msk [vmem:[%s4068_s23] sm:$0xff] %vm2495_vm0, %v2451_v15  ;;  %v1323_v48 = vpop.permute.xlu0 %1322 }
 0x204   : > { %1368 = vst.msk [vmem:[#allocation3 + $0x24] sm:$0xf] %vm1358_vm11, %v1323_v48 }
 0x205   : > { %1537 = vst.msk [vmem:[#allocation3 + $0x24] sm:$0xf] %vm1527_vm13, %v1492_v2  ;;  %v2110_v45 = vpop.permute.xlu2 %2109 }
 0x207   : > { %v2452_v36 = vpop.f32.mrf.mxu1 }
 0x208   : > { %v2453_v33 = vadd.f32 %v4063_v30, %v2452_v36 }
 0x209   : > { %v1658_v31 = vpop.permute.xlu1 %1657 }
 0x20a   : > { %1703 = vst.msk [vmem:[#allocation3 + $0x24] sm:$0xf] %vm1693_vm14, %v1658_v31 }
 0x20b   : > { %2497 = vst.msk [vmem:[%s4068_s23 + $0x8] sm:$0xff] %vm2495_vm0, %v2453_v33  ;;  %v1656_v39 = vpop.permute.xlu0 %1655 }
 0x20c   : > { %1702 = vst.msk [vmem:[#allocation3 + $0x20] sm:$0xf] %vm1693_vm14, %v1656_v39 }
 0x20d   : > { %1985 = vst.msk [vmem:[#allocation3 + $0x20] sm:$0xf] %vm1976_vm10, %v1939_v41 }
 0x211   : > { %v2108_v51 = vpop.permute.xlu1 %2107  ;;  %v2298_v0 = vpop.f32.mrf.mxu0 }
 0x212   : > { %2154 = vst.msk [vmem:[#allocation3 + $0x20] sm:$0xf] %vm2145_vm1, %v2108_v51  ;;  %v2341_v59 = vmul.f32 %v3885_v46, %v2298_v0 }
 0x213   : > { %v1941_v63 = vpop.permute.xlu0 %1940 }
 0x214   : > { %1986 = vst.msk [vmem:[#allocation3 + $0x24] sm:$0xf] %vm1976_vm10, %v1941_v63  ;;  %v2363_v12 = vadd.f32 %v3901_v9, %v2341_v59 }
 0x215   : > { %2155 = vst.msk [vmem:[#allocation3 + $0x24] sm:$0xf] %vm2145_vm1, %v2110_v45 }
 0x216   : > { %v2381_v22 = vmax.f32 %v2363_v12, 0.0 }
 0x219   : > { %v2300_v19 = vpop.f32.mrf.mxu0 }
 0x21a   : > { %v2342_v54 = vmul.f32 %v3885_v46, %v2300_v19 }
 0x21c   : > { %v2713_v7 = vld [vmem:[#allocation3 + $0x20] sm:$0xff]  ;;  %v2364_v3 = vadd.f32 %v3901_v9, %v2342_v54 }
 0x21d   : > { %2687 = vmatmul.msk.bf16.gmra.mxu0 %vm2247_vm2, %v2713_v7 }
 0x21e   : > { %v2382_v53 = vmax.f32 %v2364_v3, 0.0 }
 0x220   : > { %v2397_v8 = vpack.c.bf16 %v2382_v53, %v2381_v22 }
 0x222   : > { %2694 = vmatmul.msk.bf16.gmra.mxu1 %vm2409_vm3, %v2397_v8 }
 0x223   : > { %v2475_v44 = vpop.f32.mrf.mxu3 }
 0x224   : > { %v2476_v52 = vadd.f32 %v4063_v30, %v2475_v44 }
 0x226   : > { %2506 = vst.msk [vmem:[%s4068_s23 + $0x50] sm:$0xff] %vm2495_vm0, %v2476_v52 }
 0x22b   : > { %v2477_v47 = vpop.f32.mrf.mxu3 }
 0x22c   : > { %v2478_v60 = vadd.f32 %v4063_v30, %v2477_v47 }
 0x22e   : > { %2507 = vst.msk [vmem:[%s4068_s23 + $0x58] sm:$0xff] %vm2495_vm0, %v2478_v60 }
 0x22f   : > { %v2323_v56 = vpop.f32.mrf.mxu2 }
 0x230   : > { %v2351_v49 = vmul.f32 %v3885_v46, %v2323_v56 }
 0x232   : > { %v2373_v42 = vadd.f32 %v3901_v9, %v2351_v49 }
 0x234   : > { %v2391_v55 = vmax.f32 %v2373_v42, 0.0 }
 0x237   : > { %v2325_v25 = vpop.f32.mrf.mxu2 }
 0x238   : > { %v2352_v26 = vmul.f32 %v3885_v46, %v2325_v25 }
 0x23a   : > { %v2374_v35 = vadd.f32 %v3901_v9, %v2352_v26 }
 0x23c   : > { %v2392_v24 = vmax.f32 %v2374_v35, 0.0 }
 0x23e   : > { %v2402_v57 = vpack.c.bf16 %v2392_v24, %v2391_v55 }
 0x240   : > { %2699 = vmatmul.msk.bf16.gmra.mxu3 %vm2409_vm3, %v2402_v57 }
 0x24f   : > { %v2455_v1 = vpop.f32.mrf.mxu1 }
 0x250   : > { %v2456_v10 = vadd.f32 %v4063_v30, %v2455_v1 }
 0x252   : > { %2498 = vst.msk [vmem:[%s4068_s23 + $0x10] sm:$0xff] %vm2495_vm0, %v2456_v10 }
 0x257   : > { %v2457_v21 = vpop.f32.mrf.mxu1 }
 0x258   : > { %v2458_v50 = vadd.f32 %v4063_v30, %v2457_v21 }
 0x25a   : > { %2499 = vst.msk [vmem:[%s4068_s23 + $0x18] sm:$0xff] %vm2495_vm0, %v2458_v50 }
 0x261   : > { %v2303_v29 = vpop.f32.mrf.mxu0 }
 0x262   : > { %v2343_v13 = vmul.f32 %v3885_v46, %v2303_v29 }
 0x264   : > { %v2365_v18 = vadd.f32 %v3901_v9, %v2343_v13 }
 0x266   : > { %v2383_v43 = vmax.f32 %v2365_v18, 0.0 }
 0x269   : > { %v2305_v16 = vpop.f32.mrf.mxu0 }
 0x26a   : > { %v2344_v32 = vmul.f32 %v3885_v46, %v2305_v16 }
 0x26c   : > { %v2366_v17 = vadd.f32 %v3901_v9, %v2344_v32 }
 0x26e   : > { %v2384_v28 = vmax.f32 %v2366_v17, 0.0 }
 0x270   : > { %v2398_v23 = vpack.c.bf16 %v2384_v28, %v2383_v43 }
 0x272   : > { %2695 = vmatmul.msk.bf16.gmra.mxu1 %vm2409_vm3, %v2398_v23 }
 0x273   : > { %v2480_v61 = vpop.f32.mrf.mxu3 }
 0x274   : > { %v2481_v4 = vadd.f32 %v4063_v30, %v2480_v61 }
 0x276   : > { %2508 = vst.msk [vmem:[%s4068_s23 + $0x60] sm:$0xff] %vm2495_vm0, %v2481_v4 }
 0x27b   : > { %v2482_v5 = vpop.f32.mrf.mxu3 }
 0x27c   : > { %v2483_v20 = vadd.f32 %v4063_v30, %v2482_v5 }
 0x27e   : > { %2509 = vst.msk [vmem:[%s4068_s23 + $0x68] sm:$0xff] %vm2495_vm0, %v2483_v20 }
 0x27f   : > { %v2328_v38 = vpop.f32.mrf.mxu2 }
 0x280   : > { %v2353_v6 = vmul.f32 %v3885_v46, %v2328_v38 }
 0x282   : > { %v2375_v37 = vadd.f32 %v3901_v9, %v2353_v6 }
 0x284   : > { %v2393_v27 = vmax.f32 %v2375_v37, 0.0 }
 0x287   : > { %v2330_v14 = vpop.f32.mrf.mxu2 }
 0x288   : > { %v2354_v34 = vmul.f32 %v3885_v46, %v2330_v14 }
 0x28a   : > { %v2376_v40 = vadd.f32 %v3901_v9, %v2354_v34 }
 0x28c   : > { %v2394_v62 = vmax.f32 %v2376_v40, 0.0 }
 0x28e   : > { %v2403_v2 = vpack.c.bf16 %v2394_v62, %v2393_v27 }
 0x290   : > { %2700 = vmatmul.msk.bf16.gmra.mxu3 %vm2409_vm3, %v2403_v2 }
 0x29a   : > { %v2308_v11 = vpop.f32.mrf.mxu0 }
 0x29b   : > { %v2345_v15 = vmul.f32 %v3885_v46, %v2308_v11 }
 0x29d   : > { %v2367_v41 = vadd.f32 %v3901_v9, %v2345_v15 }
 0x29f   : > { %v2460_v58 = vpop.f32.mrf.mxu1  ;;  %v2385_v39 = vmax.f32 %v2367_v41, 0.0 }
 0x2a0   : > { %v2461_v48 = vadd.f32 %v4063_v30, %v2460_v58 }
 0x2a2   : > { %2500 = vst.msk [vmem:[%s4068_s23 + $0x20] sm:$0xff] %vm2495_vm0, %v2461_v48  ;;  %v2310_v36 = vpop.f32.mrf.mxu0 }
 0x2a3   : > { %v2346_v33 = vmul.f32 %v3885_v46, %v2310_v36 }
 0x2a5   : > { %v2368_v31 = vadd.f32 %v3901_v9, %v2346_v33 }
 0x2a7   : > { %v2386_v51 = vmax.f32 %v2368_v31, 0.0  ;;  %v2462_v0 = vpop.f32.mrf.mxu1 }
 0x2a8   : > { %v2463_v45 = vadd.f32 %v4063_v30, %v2462_v0 }
 0x2a9   : > { %v2399_v63 = vpack.c.bf16 %v2386_v51, %v2385_v39 }
 0x2aa   : > { %2501 = vst.msk [vmem:[%s4068_s23 + $0x28] sm:$0xff] %vm2495_vm0, %v2463_v45 }
 0x2ab   : > { %2696 = vmatmul.msk.bf16.gmra.mxu1 %vm2409_vm3, %v2399_v63 }
 0x2c3   : > { %v2485_v59 = vpop.f32.mrf.mxu3 }
 0x2c4   : > { %v2486_v19 = vadd.f32 %v4063_v30, %v2485_v59 }
 0x2c6   : > { %2510 = vst.msk [vmem:[%s4068_s23 + $0x70] sm:$0xff] %vm2495_vm0, %v2486_v19 }
 0x2cb   : > { %v2487_v46 = vpop.f32.mrf.mxu3 }
 0x2cc   : > { %v2488_v9 = vadd.f32 %v4063_v30, %v2487_v46 }
 0x2ce   : > { %2511 = vst.msk [vmem:[%s4068_s23 + $0x78] sm:$0xff] %vm2495_vm0, %v2488_v9 }
 0x2ef   : > { %v2465_v12 = vpop.f32.mrf.mxu1 }
 0x2f0   : > { %v2466_v54 = vadd.f32 %v4063_v30, %v2465_v12 }
 0x2f2   : > { %2502 = vst.msk [vmem:[%s4068_s23 + $0x30] sm:$0xff] %vm2495_vm0, %v2466_v54 }
 0x2f7   : > { %v2467_v7 = vpop.f32.mrf.mxu1 }
 0x2f8   : > { %v2468_v3 = vadd.f32 %v4063_v30, %v2467_v7 }
 0x2fa   : > { %2503 = vst.msk [vmem:[%s4068_s23 + $0x38] sm:$0xff] %vm2495_vm0, %v2468_v3 }
 0x313   : > { %v2490_v22 = vpop.f32.mrf.mxu3 }
 0x314   : > { %v2491_v53 = vadd.f32 %v4063_v30, %v2490_v22 }
 0x316   : > { %2512 = vst.msk [vmem:[%s4068_s23 + $0x80] sm:$0xff] %vm2495_vm0, %v2491_v53 }
 0x31b   : > { %v2492_v8 = vpop.f32.mrf.mxu3 }
 0x31c   : > { %v2493_v44 = vadd.f32 %v4063_v30, %v2492_v8 }
 0x31e   : > { %2513 = vst.msk [vmem:[%s4068_s23 + $0x88] sm:$0xff] %vm2495_vm0, %v2493_v44 }
 0x328   : > { %v2470_v52 = vpop.f32.mrf.mxu1 }
 0x329   : > { %v2471_v47 = vadd.f32 %v4063_v30, %v2470_v52 }
 0x32b   : > { %2504 = vst.msk [vmem:[%s4068_s23 + $0x40] sm:$0xff] %vm2495_vm0, %v2471_v47 }
 0x330   : > { %v2472_v60 = vpop.f32.mrf.mxu1 }
 0x331   : > { %v2473_v56 = vadd.f32 %v4063_v30, %v2472_v60 }
 0x333   : > { %2505 = vst.msk [vmem:[%s4068_s23 + $0x48] sm:$0xff] %vm2495_vm0, %v2473_v56 }
 0x334 PF: > { %s17_s28 = sadd.s32 1, %s2815_s28   ;;  %s4202_s24 = smov %s2807_s26 }
 0x335   : > { %p14_p9 = scmp.ge.s32.totalorder %s17_s28, 6   ;;  %s4203_s25 = smov %s2811_s27 }
 0x336   : > { %s4204_s26 = smov %s4207_s29  ;;  %s4205_s27 = smov %s4211_s30 }
 0x337   :  { %16 = sbr.rel (!%p14_p9) target bundleno = 3 (0x3), region = 81 }

</bundles_post_ra>
